<compile_context>
chip_gen: v5e
topology: v5e:2x2
jax: 0.10.0
libtpu: 0.0.40
codegen_flags: <defaults>
</compile_context>

<pallas_src>
import math

import jax
import jax.numpy as jnp
from jax.experimental import pallas as pl
from jax.experimental.pallas import tpu as pltpu

# config (consistent with the module)
EMBED = 32           # config.embed_size
NUM_HEADS = 4
HEAD = EMBED // NUM_HEADS
WINDOW = 8           # config.window_size
NEG_INF = -1e30

_TARGET_ROWS = 512   # ~rows (tb*T) of work per grid step


def mha_kernel(x_ref, wqkv_ref, wp_ref, bp_ref, bias_ref, y_ref):
    rows, C = x_ref.shape          # rows = tb * T
    T = bias_ref.shape[0]
    TB = rows // T

    x = x_ref[...]                 # (rows, C) bf16, cast done in the wrapper

    # Fused QKV projection: one (rows, C) @ (C, 3C) bf16 MXU matmul, f32 acc.
    qkv = jnp.dot(x, wqkv_ref[...], preferred_element_type=jnp.float32)
    qkv = qkv.reshape(TB, T, 3 * C)          # leading-dim split (layout-free)

    # NOTE: reference scales by sqrt(full embed dim C), not sqrt(head_size).
    scale = 1.0 / (C ** 0.5)
    causal_bias = bias_ref[...][None]        # (1, T, T) additive mask, hoisted

    head_outs = []
    for h in range(NUM_HEADS):               # static, unrolled (4 heads)
        lo = h * HEAD
        qh = qkv[:, :, lo:lo + HEAD].astype(jnp.bfloat16)
        kh = qkv[:, :, C + lo:C + lo + HEAD].astype(jnp.bfloat16)
        vh = qkv[:, :, 2 * C + lo:2 * C + lo + HEAD].astype(jnp.bfloat16)

        # Batched scores, contraction on the trailing dim (no explicit k.T).
        e = jnp.einsum("bqd,bkd->bqk", qh, kh,
                       preferred_element_type=jnp.float32) * scale
        e = e + causal_bias
        m = jnp.max(e, axis=-1, keepdims=True)
        p = jnp.exp(e - m)
        a = p * pl.reciprocal(jnp.sum(p, axis=-1, keepdims=True), approx=True)

        head_outs.append(
            jnp.einsum("bqk,bkd->bqd", a.astype(jnp.bfloat16), vh,
                       preferred_element_type=jnp.float32))   # (TB, T, HEAD)

    # Concat heads along lanes -> (rows, C); single fused output projection.
    o = jnp.concatenate(head_outs, axis=-1).reshape(rows, C).astype(jnp.bfloat16)
    y = jnp.dot(o, wp_ref[...], preferred_element_type=jnp.float32)

    # TODO(synk): nn.Dropout treated as identity (inference / eval mode).
    y_ref[...] = y + bp_ref[...]             # (1, C) bias broadcast, f32


def multi_head_attention(x, params, tb=None):
    """params = (wq, wk, wv, wproj, bproj); weights stored (in, out), bproj (1, C)."""
    B, T, C = x.shape
    assert C == EMBED and T <= WINDOW
    wq, wk, wv, wp, bp = params

    if tb is None:
        # ~_TARGET_ROWS rows per grid step to amortize the ~0.35us/step fixed
        # overhead, but keep >= 2 grid steps when B allows so the "parallel"
        # axis shards across both TensorCores on v7x.
        tb = max(1, min(B, _TARGET_ROWS // T))
        if B >= 2:
            tb = min(tb, pl.cdiv(B, 2))
    # Row-block (tb*T) must be sublane-aligned; align tb up (batch is padded).
    if (tb * T) % 8 != 0:
        mult = 8 // math.gcd(T, 8)
        tb = pl.cdiv(tb, mult) * mult

    grid_b = pl.cdiv(B, tb)
    b_pad = grid_b * tb
    if b_pad != B:
        x = jnp.pad(x, ((0, b_pad - B), (0, 0), (0, 0)))

    # bf16 HBM->VMEM traffic for the activation slab; row-flat 2D layout so the
    # kernel needs no I/O reshape.  Weights fused/pre-cast once here.
    x2d = x.reshape(b_pad * T, C).astype(jnp.bfloat16)
    wqkv = jnp.concatenate([wq, wk, wv], axis=1).astype(jnp.bfloat16)   # (C, 3C)
    wp_b = wp.astype(jnp.bfloat16)
    bp_f = bp.reshape(1, C).astype(jnp.float32)

    # Additive causal mask, built once (not per grid step).
    row_i = jax.lax.broadcasted_iota(jnp.int32, (T, T), 0)
    col_i = jax.lax.broadcasted_iota(jnp.int32, (T, T), 1)
    causal_bias = jnp.where(col_i <= row_i, 0.0, NEG_INF).astype(jnp.float32)

    y = pl.pallas_call(
        mha_kernel,
        out_shape=jax.ShapeDtypeStruct((b_pad * T, C), jnp.float32),
        grid=(grid_b,),
        in_specs=[
            pl.BlockSpec((tb * T, C), lambda b: (b, 0)),      # x, batch-chunked
            pl.BlockSpec((C, 3 * C), lambda b: (0, 0)),       # fused Wq|Wk|Wv
            pl.BlockSpec((C, C), lambda b: (0, 0)),           # Wproj
            pl.BlockSpec((1, C), lambda b: (0, 0)),           # bproj
            pl.BlockSpec((T, T), lambda b: (0, 0)),           # causal bias
        ],
        out_specs=pl.BlockSpec((tb * T, C), lambda b: (b, 0)),
        compiler_params=pltpu.CompilerParams(
            dimension_semantics=("parallel",)),
    )(x2d, wqkv, wp_b, bp_f, causal_bias)

    return y[: B * T].reshape(B, T, C)


def reference(x, params):
    """Pure-JAX f32 reference of the PyTorch MultiHeadAttention forward."""
    wq, wk, wv, wp, bp = params
    B, T, C = x.shape
    q = (x @ wq).reshape(B, T, NUM_HEADS, HEAD).transpose(0, 2, 1, 3)
    k = (x @ wk).reshape(B, T, NUM_HEADS, HEAD).transpose(0, 2, 1, 3)
    v = (x @ wv).reshape(B, T, NUM_HEADS, HEAD).transpose(0, 2, 1, 3)
    e = jnp.einsum("bhqd,bhkd->bhqk", q, k) / (C ** 0.5)
    mask = jnp.tril(jnp.ones((T, T), bool))
    e = jnp.where(mask, e, -jnp.inf)
    a = jax.nn.softmax(e, axis=-1)
    o = jnp.einsum("bhqk,bhkd->bhqd", a, v).transpose(0, 2, 1, 3).reshape(B, T, C)
    return o @ wp + bp


if __name__ == "__main__":
    B, T, C = 16, WINDOW, EMBED
    key = jax.random.PRNGKey(0)
    keys = jax.random.split(key, 6)

    x = jax.random.normal(keys[0], (B, T, C), jnp.float32)

    def w(k, shape, scale=0.1):
        return (scale * jax.random.normal(k, shape)).astype(jnp.float32)

    params = (
        w(keys[1], (C, C)),     # Wq, heads packed along output columns (in, out)
        w(keys[2], (C, C)),     # Wk
        w(keys[3], (C, C)),     # Wv
        w(keys[4], (C, C)),     # Wproj
        w(keys[5], (1, C)),     # bproj
    )

    # Default tb heuristic -> tb=8, grid=(2,): >= 2 parallel grid steps
    # (both TensorCores on v7x), 64 rows per step at this small demo size.
    y = multi_head_attention(x, params)
    y = jax.block_until_ready(y)

    y_ref = reference(x, params)
    err = float(jnp.max(jnp.abs(y - y_ref)))
    assert jnp.allclose(y, y_ref, atol=3e-2, rtol=3e-2), (
        f"mismatch vs JAX reference, max|err|={err}")

    print("KERNEL_OK")
</pallas_src>

<mosaic_0001>
module attributes {stable_mosaic.version = 11 : i64} {
  func.func @mha_kernel(%arg0: i32, %arg1: memref<64x32xbf16, #tpu.memory_space<vmem>>, %arg2: memref<32x96xbf16, #tpu.memory_space<vmem>>, %arg3: memref<32x32xbf16, #tpu.memory_space<vmem>>, %arg4: memref<1x32xf32, #tpu.memory_space<vmem>>, %arg5: memref<8x8xf32, #tpu.memory_space<vmem>>, %arg6: memref<64x32xf32, #tpu.memory_space<vmem>>) attributes {dimension_semantics = [#tpu.dimension_semantics<parallel>], iteration_bounds = array<i64: 2>, scalar_prefetch = 0 : i64, scratch_operands = 0 : i64, tpu.core_type = #tpu.core_type<tc>, window_params = [{transform_indices = @transform_0, window_bounds = array<i64: 64, 32>}, {pipeline_mode = #tpu.pipeline_mode<synchronous>, transform_indices = @transform_1, window_bounds = array<i64: 32, 96>}, {pipeline_mode = #tpu.pipeline_mode<synchronous>, transform_indices = @transform_2, window_bounds = array<i64: 32, 32>}, {pipeline_mode = #tpu.pipeline_mode<synchronous>, transform_indices = @transform_3, window_bounds = array<i64: 1, 32>}, {pipeline_mode = #tpu.pipeline_mode<synchronous>, transform_indices = @transform_4, window_bounds = array<i64: 8, 8>}, {transform_indices = @transform_5, window_bounds = array<i64: 64, 32>}]} {
    %c0 = arith.constant 0 : index
    %c0_0 = arith.constant 0 : index
    %0 = vector.load %arg1[%c0, %c0_0] : memref<64x32xbf16, #tpu.memory_space<vmem>>, vector<64x32xbf16>
    %c0_1 = arith.constant 0 : index
    %c0_2 = arith.constant 0 : index
    %1 = vector.load %arg2[%c0_1, %c0_2] : memref<32x96xbf16, #tpu.memory_space<vmem>>, vector<32x96xbf16>
    %cst = arith.constant dense<0.000000e+00> : vector<64x96xf32>
    %2 = tpu.matmul %0, %1, %cst {dimension_numbers = #tpu.dot_dimension_numbers<[1], [0], [0], [1], [0, 0, 1, 1], [], []>} : vector<64x32xbf16>, vector<32x96xbf16>, vector<64x96xf32> -> vector<64x96xf32>
    %3 = vector.shape_cast %2 : vector<64x96xf32> to vector<8x8x96xf32>
    %c0_3 = arith.constant 0 : index
    %c0_4 = arith.constant 0 : index
    %4 = vector.load %arg5[%c0_3, %c0_4] : memref<8x8xf32, #tpu.memory_space<vmem>>, vector<8x8xf32>
    %5 = vector.shape_cast %4 : vector<8x8xf32> to vector<1x8x8xf32>
    %6 = vector.extract_strided_slice %3 {offsets = [0, 0, 0], sizes = [8, 8, 8], strides = [1, 1, 1]} : vector<8x8x96xf32> to vector<8x8x8xf32>
    %7 = arith.truncf %6 : vector<8x8x8xf32> to vector<8x8x8xbf16>
    %8 = vector.extract_strided_slice %3 {offsets = [0, 0, 32], sizes = [8, 8, 8], strides = [1, 1, 1]} : vector<8x8x96xf32> to vector<8x8x8xf32>
    %9 = arith.truncf %8 : vector<8x8x8xf32> to vector<8x8x8xbf16>
    %10 = vector.extract_strided_slice %3 {offsets = [0, 0, 64], sizes = [8, 8, 8], strides = [1, 1, 1]} : vector<8x8x96xf32> to vector<8x8x8xf32>
    %11 = arith.truncf %10 : vector<8x8x8xf32> to vector<8x8x8xbf16>
    "tpu.trace_start"() <{level = 10 : i32, message = "bqd,bkd->bqk"}> : () -> ()
    %cst_5 = arith.constant dense<0.000000e+00> : vector<8x8x8xf32>
    %12 = tpu.matmul %7, %9, %cst_5 {dimension_numbers = #tpu.dot_dimension_numbers<[2], [2], [1], [1], [0, 0, 0, 1, 1, 1], [0], [0]>} : vector<8x8x8xbf16>, vector<8x8x8xbf16>, vector<8x8x8xf32> -> vector<8x8x8xf32>
    "tpu.trace_stop"() : () -> ()
    %cst_6 = arith.constant 0.176776692 : f32
    %13 = vector.broadcast %cst_6 : f32 to vector<8x8x8xf32>
    %14 = arith.mulf %12, %13 : vector<8x8x8xf32>
    %15 = vector.broadcast %5 : vector<1x8x8xf32> to vector<8x8x8xf32>
    %16 = arith.addf %14, %15 : vector<8x8x8xf32>
    %cst_7 = arith.constant dense<0xFF800000> : vector<8x8xf32>
    %17 = vector.multi_reduction <maximumf>, %16, %cst_7 [2] : vector<8x8x8xf32> to vector<8x8xf32>
    %18 = vector.shape_cast %17 : vector<8x8xf32> to vector<8x8x1xf32>
    %19 = vector.broadcast %18 : vector<8x8x1xf32> to vector<8x8x8xf32>
    %20 = arith.subf %16, %19 : vector<8x8x8xf32>
    %21 = math.exp %20 : vector<8x8x8xf32>
    %cst_8 = arith.constant dense<0.000000e+00> : vector<8x8xf32>
    %22 = vector.multi_reduction <add>, %21, %cst_8 [2] : vector<8x8x8xf32> to vector<8x8xf32>
    %23 = vector.shape_cast %22 : vector<8x8xf32> to vector<8x8x1xf32>
    %24 = tpu.reciprocal %23 {approx = true} : vector<8x8x1xf32> -> vector<8x8x1xf32>
    %25 = vector.broadcast %24 : vector<8x8x1xf32> to vector<8x8x8xf32>
    %26 = arith.mulf %21, %25 : vector<8x8x8xf32>
    %27 = arith.truncf %26 : vector<8x8x8xf32> to vector<8x8x8xbf16>
    "tpu.trace_start"() <{level = 10 : i32, message = "bqk,bkd->bqd"}> : () -> ()
    %cst_9 = arith.constant dense<0.000000e+00> : vector<8x8x8xf32>
    %28 = tpu.matmul %27, %11, %cst_9 {dimension_numbers = #tpu.dot_dimension_numbers<[2], [1], [1], [2], [0, 0, 0, 1, 1, 2], [0], [0]>} : vector<8x8x8xbf16>, vector<8x8x8xbf16>, vector<8x8x8xf32> -> vector<8x8x8xf32>
    "tpu.trace_stop"() : () -> ()
    %29 = vector.extract_strided_slice %3 {offsets = [0, 0, 8], sizes = [8, 8, 8], strides = [1, 1, 1]} : vector<8x8x96xf32> to vector<8x8x8xf32>
    %30 = arith.truncf %29 : vector<8x8x8xf32> to vector<8x8x8xbf16>
    %31 = vector.extract_strided_slice %3 {offsets = [0, 0, 40], sizes = [8, 8, 8], strides = [1, 1, 1]} : vector<8x8x96xf32> to vector<8x8x8xf32>
    %32 = arith.truncf %31 : vector<8x8x8xf32> to vector<8x8x8xbf16>
    %33 = vector.extract_strided_slice %3 {offsets = [0, 0, 72], sizes = [8, 8, 8], strides = [1, 1, 1]} : vector<8x8x96xf32> to vector<8x8x8xf32>
    %34 = arith.truncf %33 : vector<8x8x8xf32> to vector<8x8x8xbf16>
    "tpu.trace_start"() <{level = 10 : i32, message = "bqd,bkd->bqk"}> : () -> ()
    %cst_10 = arith.constant dense<0.000000e+00> : vector<8x8x8xf32>
    %35 = tpu.matmul %30, %32, %cst_10 {dimension_numbers = #tpu.dot_dimension_numbers<[2], [2], [1], [1], [0, 0, 0, 1, 1, 1], [0], [0]>} : vector<8x8x8xbf16>, vector<8x8x8xbf16>, vector<8x8x8xf32> -> vector<8x8x8xf32>
    "tpu.trace_stop"() : () -> ()
    %cst_11 = arith.constant 0.176776692 : f32
    %36 = vector.broadcast %cst_11 : f32 to vector<8x8x8xf32>
    %37 = arith.mulf %35, %36 : vector<8x8x8xf32>
    %38 = vector.broadcast %5 : vector<1x8x8xf32> to vector<8x8x8xf32>
    %39 = arith.addf %37, %38 : vector<8x8x8xf32>
    %cst_12 = arith.constant dense<0xFF800000> : vector<8x8xf32>
    %40 = vector.multi_reduction <maximumf>, %39, %cst_12 [2] : vector<8x8x8xf32> to vector<8x8xf32>
    %41 = vector.shape_cast %40 : vector<8x8xf32> to vector<8x8x1xf32>
    %42 = vector.broadcast %41 : vector<8x8x1xf32> to vector<8x8x8xf32>
    %43 = arith.subf %39, %42 : vector<8x8x8xf32>
    %44 = math.exp %43 : vector<8x8x8xf32>
    %cst_13 = arith.constant dense<0.000000e+00> : vector<8x8xf32>
    %45 = vector.multi_reduction <add>, %44, %cst_13 [2] : vector<8x8x8xf32> to vector<8x8xf32>
    %46 = vector.shape_cast %45 : vector<8x8xf32> to vector<8x8x1xf32>
    %47 = tpu.reciprocal %46 {approx = true} : vector<8x8x1xf32> -> vector<8x8x1xf32>
    %48 = vector.broadcast %47 : vector<8x8x1xf32> to vector<8x8x8xf32>
    %49 = arith.mulf %44, %48 : vector<8x8x8xf32>
    %50 = arith.truncf %49 : vector<8x8x8xf32> to vector<8x8x8xbf16>
    "tpu.trace_start"() <{level = 10 : i32, message = "bqk,bkd->bqd"}> : () -> ()
    %cst_14 = arith.constant dense<0.000000e+00> : vector<8x8x8xf32>
    %51 = tpu.matmul %50, %34, %cst_14 {dimension_numbers = #tpu.dot_dimension_numbers<[2], [1], [1], [2], [0, 0, 0, 1, 1, 2], [0], [0]>} : vector<8x8x8xbf16>, vector<8x8x8xbf16>, vector<8x8x8xf32> -> vector<8x8x8xf32>
    "tpu.trace_stop"() : () -> ()
    %52 = vector.extract_strided_slice %3 {offsets = [0, 0, 16], sizes = [8, 8, 8], strides = [1, 1, 1]} : vector<8x8x96xf32> to vector<8x8x8xf32>
    %53 = arith.truncf %52 : vector<8x8x8xf32> to vector<8x8x8xbf16>
    %54 = vector.extract_strided_slice %3 {offsets = [0, 0, 48], sizes = [8, 8, 8], strides = [1, 1, 1]} : vector<8x8x96xf32> to vector<8x8x8xf32>
    %55 = arith.truncf %54 : vector<8x8x8xf32> to vector<8x8x8xbf16>
    %56 = vector.extract_strided_slice %3 {offsets = [0, 0, 80], sizes = [8, 8, 8], strides = [1, 1, 1]} : vector<8x8x96xf32> to vector<8x8x8xf32>
    %57 = arith.truncf %56 : vector<8x8x8xf32> to vector<8x8x8xbf16>
    "tpu.trace_start"() <{level = 10 : i32, message = "bqd,bkd->bqk"}> : () -> ()
    %cst_15 = arith.constant dense<0.000000e+00> : vector<8x8x8xf32>
    %58 = tpu.matmul %53, %55, %cst_15 {dimension_numbers = #tpu.dot_dimension_numbers<[2], [2], [1], [1], [0, 0, 0, 1, 1, 1], [0], [0]>} : vector<8x8x8xbf16>, vector<8x8x8xbf16>, vector<8x8x8xf32> -> vector<8x8x8xf32>
    "tpu.trace_stop"() : () -> ()
    %cst_16 = arith.constant 0.176776692 : f32
    %59 = vector.broadcast %cst_16 : f32 to vector<8x8x8xf32>
    %60 = arith.mulf %58, %59 : vector<8x8x8xf32>
    %61 = vector.broadcast %5 : vector<1x8x8xf32> to vector<8x8x8xf32>
    %62 = arith.addf %60, %61 : vector<8x8x8xf32>
    %cst_17 = arith.constant dense<0xFF800000> : vector<8x8xf32>
    %63 = vector.multi_reduction <maximumf>, %62, %cst_17 [2] : vector<8x8x8xf32> to vector<8x8xf32>
    %64 = vector.shape_cast %63 : vector<8x8xf32> to vector<8x8x1xf32>
    %65 = vector.broadcast %64 : vector<8x8x1xf32> to vector<8x8x8xf32>
    %66 = arith.subf %62, %65 : vector<8x8x8xf32>
    %67 = math.exp %66 : vector<8x8x8xf32>
    %cst_18 = arith.constant dense<0.000000e+00> : vector<8x8xf32>
    %68 = vector.multi_reduction <add>, %67, %cst_18 [2] : vector<8x8x8xf32> to vector<8x8xf32>
    %69 = vector.shape_cast %68 : vector<8x8xf32> to vector<8x8x1xf32>
    %70 = tpu.reciprocal %69 {approx = true} : vector<8x8x1xf32> -> vector<8x8x1xf32>
    %71 = vector.broadcast %70 : vector<8x8x1xf32> to vector<8x8x8xf32>
    %72 = arith.mulf %67, %71 : vector<8x8x8xf32>
    %73 = arith.truncf %72 : vector<8x8x8xf32> to vector<8x8x8xbf16>
    "tpu.trace_start"() <{level = 10 : i32, message = "bqk,bkd->bqd"}> : () -> ()
    %cst_19 = arith.constant dense<0.000000e+00> : vector<8x8x8xf32>
    %74 = tpu.matmul %73, %57, %cst_19 {dimension_numbers = #tpu.dot_dimension_numbers<[2], [1], [1], [2], [0, 0, 0, 1, 1, 2], [0], [0]>} : vector<8x8x8xbf16>, vector<8x8x8xbf16>, vector<8x8x8xf32> -> vector<8x8x8xf32>
    "tpu.trace_stop"() : () -> ()
    %75 = vector.extract_strided_slice %3 {offsets = [0, 0, 24], sizes = [8, 8, 8], strides = [1, 1, 1]} : vector<8x8x96xf32> to vector<8x8x8xf32>
    %76 = arith.truncf %75 : vector<8x8x8xf32> to vector<8x8x8xbf16>
    %77 = vector.extract_strided_slice %3 {offsets = [0, 0, 56], sizes = [8, 8, 8], strides = [1, 1, 1]} : vector<8x8x96xf32> to vector<8x8x8xf32>
    %78 = arith.truncf %77 : vector<8x8x8xf32> to vector<8x8x8xbf16>
    %79 = vector.extract_strided_slice %3 {offsets = [0, 0, 88], sizes = [8, 8, 8], strides = [1, 1, 1]} : vector<8x8x96xf32> to vector<8x8x8xf32>
    %80 = arith.truncf %79 : vector<8x8x8xf32> to vector<8x8x8xbf16>
    "tpu.trace_start"() <{level = 10 : i32, message = "bqd,bkd->bqk"}> : () -> ()
    %cst_20 = arith.constant dense<0.000000e+00> : vector<8x8x8xf32>
    %81 = tpu.matmul %76, %78, %cst_20 {dimension_numbers = #tpu.dot_dimension_numbers<[2], [2], [1], [1], [0, 0, 0, 1, 1, 1], [0], [0]>} : vector<8x8x8xbf16>, vector<8x8x8xbf16>, vector<8x8x8xf32> -> vector<8x8x8xf32>
    "tpu.trace_stop"() : () -> ()
    %cst_21 = arith.constant 0.176776692 : f32
    %82 = vector.broadcast %cst_21 : f32 to vector<8x8x8xf32>
    %83 = arith.mulf %81, %82 : vector<8x8x8xf32>
    %84 = vector.broadcast %5 : vector<1x8x8xf32> to vector<8x8x8xf32>
    %85 = arith.addf %83, %84 : vector<8x8x8xf32>
    %cst_22 = arith.constant dense<0xFF800000> : vector<8x8xf32>
    %86 = vector.multi_reduction <maximumf>, %85, %cst_22 [2] : vector<8x8x8xf32> to vector<8x8xf32>
    %87 = vector.shape_cast %86 : vector<8x8xf32> to vector<8x8x1xf32>
    %88 = vector.broadcast %87 : vector<8x8x1xf32> to vector<8x8x8xf32>
    %89 = arith.subf %85, %88 : vector<8x8x8xf32>
    %90 = math.exp %89 : vector<8x8x8xf32>
    %cst_23 = arith.constant dense<0.000000e+00> : vector<8x8xf32>
    %91 = vector.multi_reduction <add>, %90, %cst_23 [2] : vector<8x8x8xf32> to vector<8x8xf32>
    %92 = vector.shape_cast %91 : vector<8x8xf32> to vector<8x8x1xf32>
    %93 = tpu.reciprocal %92 {approx = true} : vector<8x8x1xf32> -> vector<8x8x1xf32>
    %94 = vector.broadcast %93 : vector<8x8x1xf32> to vector<8x8x8xf32>
    %95 = arith.mulf %90, %94 : vector<8x8x8xf32>
    %96 = arith.truncf %95 : vector<8x8x8xf32> to vector<8x8x8xbf16>
    "tpu.trace_start"() <{level = 10 : i32, message = "bqk,bkd->bqd"}> : () -> ()
    %cst_24 = arith.constant dense<0.000000e+00> : vector<8x8x8xf32>
    %97 = tpu.matmul %96, %80, %cst_24 {dimension_numbers = #tpu.dot_dimension_numbers<[2], [1], [1], [2], [0, 0, 0, 1, 1, 2], [0], [0]>} : vector<8x8x8xbf16>, vector<8x8x8xbf16>, vector<8x8x8xf32> -> vector<8x8x8xf32>
    "tpu.trace_stop"() : () -> ()
    %98 = tpu.concatenate %28, %51, %74, %97 in 2 : vector<8x8x8xf32>, vector<8x8x8xf32>, vector<8x8x8xf32>, vector<8x8x8xf32> -> vector<8x8x32xf32>
    %99 = vector.shape_cast %98 : vector<8x8x32xf32> to vector<64x32xf32>
    %100 = arith.truncf %99 : vector<64x32xf32> to vector<64x32xbf16>
    %c0_25 = arith.constant 0 : index
    %c0_26 = arith.constant 0 : index
    %101 = vector.load %arg3[%c0_25, %c0_26] : memref<32x32xbf16, #tpu.memory_space<vmem>>, vector<32x32xbf16>
    %cst_27 = arith.constant dense<0.000000e+00> : vector<64x32xf32>
    %102 = tpu.matmul %100, %101, %cst_27 {dimension_numbers = #tpu.dot_dimension_numbers<[1], [0], [0], [1], [0, 0, 1, 1], [], []>} : vector<64x32xbf16>, vector<32x32xbf16>, vector<64x32xf32> -> vector<64x32xf32>
    %c0_28 = arith.constant 0 : index
    %c0_29 = arith.constant 0 : index
    %103 = vector.load %arg4[%c0_28, %c0_29] : memref<1x32xf32, #tpu.memory_space<vmem>>, vector<1x32xf32>
    %104 = vector.broadcast %103 : vector<1x32xf32> to vector<64x32xf32>
    %105 = arith.addf %102, %104 : vector<64x32xf32>
    %c0_30 = arith.constant 0 : index
    %c0_31 = arith.constant 0 : index
    %106 = vector.load %arg6[%c0_30, %c0_31] : memref<64x32xf32, #tpu.memory_space<vmem>>, vector<64x32xf32>
    tpu.vector_store %arg6[%c0_30, %c0_31], %105 {strides = array<i32>} : memref<64x32xf32, #tpu.memory_space<vmem>>, vector<64x32xf32>,
    return
  }
  func.func @transform_0(%arg0: i32) -> (i32, i32) {
    %c0_i32 = arith.constant 0 : i32
    %c0_i32_0 = arith.constant 0 : i32
    return %arg0, %c0_i32 : i32, i32
  }
  func.func @transform_1(%arg0: i32) -> (i32, i32) {
    %c0_i32 = arith.constant 0 : i32
    %c0_i32_0 = arith.constant 0 : i32
    %c0_i32_1 = arith.constant 0 : i32
    return %c0_i32, %c0_i32_0 : i32, i32
  }
  func.func @transform_2(%arg0: i32) -> (i32, i32) {
    %c0_i32 = arith.constant 0 : i32
    %c0_i32_0 = arith.constant 0 : i32
    %c0_i32_1 = arith.constant 0 : i32
    return %c0_i32, %c0_i32_0 : i32, i32
  }
  func.func @transform_3(%arg0: i32) -> (i32, i32) {
    %c0_i32 = arith.constant 0 : i32
    %c0_i32_0 = arith.constant 0 : i32
    %c0_i32_1 = arith.constant 0 : i32
    return %c0_i32, %c0_i32_0 : i32, i32
  }
  func.func @transform_4(%arg0: i32) -> (i32, i32) {
    %c0_i32 = arith.constant 0 : i32
    %c0_i32_0 = arith.constant 0 : i32
    %c0_i32_1 = arith.constant 0 : i32
    return %c0_i32, %c0_i32_0 : i32, i32
  }
  func.func @transform_5(%arg0: i32) -> (i32, i32) {
    %c0_i32 = arith.constant 0 : i32
    %c0_i32_0 = arith.constant 0 : i32
    return %arg0, %c0_i32 : i32, i32
  }
}

</mosaic_0001>

<bundles_post_ra>
// kernel: tpu_custom_call.1
= control target key start
LH: loop header
LB: loop body
LE: loop exit
PB: predicated region body
PF: predicated region fallthrough
CT: control target
= control target key end

     0   :  { %s2834_s18 = smov 0   ;;  %s3627_s0 = inlined_call_operand.vmem [shape: bf16[128,32], index: 0, kind: input, shape index: {}]   ;;  %s3628_s1 = inlined_call_operand.vmem [shape: bf16[32,96], index: 1, kind: input, shape index: {}]   ;;  %s3629_s2 = inlined_call_operand.vmem [shape: bf16[32,32], index: 2, kind: input, shape index: {}]   ;;  %s3630_s3 = inlined_call_operand.vmem [shape: f32[1,32], index: 3, kind: input, shape index: {}]   ;;  %s3631_s4 = inlined_call_operand.vmem [shape: f32[8,8], index: 4, kind: input, shape index: {}]   ;;  %s3632_s5 = inlined_call_operand.vmem [shape: f32[128,32], index: 5, kind: output, shape index: {}]  }
   0x1 LB: > { %s2441_s19 = sadd.s32 4294967295, %s2788_s18   ;;  %p2445_p0 = scmp.ge.s32.totalorder %s2788_s18, 1  ;;  %s2788_s18 = sphi %s2834_s18, %s15_s18  }
   0x2   : > { %p188_p1 = scmp.lt.s32.totalorder %s2788_s18, 3 }
   0x4   : > { %p189_p2 = pnand %p2445_p0, %p188_p1 }
   0x5   : > { %s2446_s22 = sshll.u32 (!%p189_p2), %s2441_s19, 3  ;;  %s2790_s29 = smov (!%p189_p2), 96  }
   0x6   : > { %192 = sbr.rel (%p189_p2) target bundleno = 2542 (0x9ee), region = 40  ;;  %p217_p3 = scmp.lt.s32.totalorder (!%p189_p2), %s2446_s22, 15 }
   0x7   : > { %s2791_s30 = smov (!%p189_p2), 64   ;;  %s2792_s6 = smov (!%p189_p2), 88  }
   0x8   : > { %s2793_s7 = smov (!%p189_p2), 120   ;;  %s2794_s10 = smov (!%p189_p2), 56  }
   0x9   : > { %s2795_s11 = smov (!%p189_p2), 80   ;;  %s2796_s12 = smov (!%p189_p2), 112  }
   0xa   : > { %s2797_s13 = smov (!%p189_p2), 48   ;;  %s2798_s14 = smov (!%p189_p2), 72  }
   0xb   : > { %v2561_v0 = vld [vmem:[%s3628_s1 + $0x8] sm:$0xff]  ;;  %v2560_v1 = vld [vmem:[%s3628_s1] sm:$0xff]  ;;  %s3634_s22 = smov (!%p217_p3, %s2446_s22), 15  ;;  %vm273_vm0 = vcmask 261120   ;;  %vm329_vm1 = vcmask 64512   ;;  %vm634_vm2 = vcmask 1043456  }
   0xc   : > { %292 = vmatpush.bf16.msra.mxu0 %v2561_v0  ;;  %2564 = vmatpush.bf16.msra.mxu1 %v2561_v0  ;;  %s2447_s25 = sshll.u32 %s3634_s22, 2  ;;  %s2799_s17 = smov 104   ;;  %vm2294_vm3 = vcmask 130048   ;;  %vm2303_vm4 = vcmask 195584  }
   0xd   : > { %2565 = vmatpush.bf16.msra.mxu2 %v2561_v0  ;;  %2566 = vmatpush.bf16.msra.mxu3 %v2561_v0  ;;  %s220_s28 = scalar_lea.vmem %s3627_s0, %s2447_s25  ;;  %s2800_s19 = smov 40  }
   0xe   : > { %v2556_v2 = vld [vmem:[%s220_s28] sm:$0xff]  ;;  %v2557_v3 = vld [vmem:[%s220_s28 + $0x8] sm:$0xff]  ;;  %v2558_v4 = vld [vmem:[%s220_s28 + $0x10] sm:$0xff]  ;;  %s2801_s20 = smov 8   ;;  %s2802_s21 = smov 16  }
   0xf   : > { %v2559_v5 = vld [vmem:[%s220_s28 + $0x18] sm:$0xff]  ;;  %s2803_s23 = smov 24   ;;  %s2449_s28 = sshll.u32 %s3634_s22, 3 }
  0x10   : > { %293 = vmatpush.bf16.msra.mxu0 %v2560_v1  ;;  %2567 = vmatpush.bf16.msra.mxu1 %v2560_v1  ;;  %s226_s8 = scalar_lea.vmem %s3632_s5, %s2449_s28 }
  0x11   : > { %2568 = vmatpush.bf16.msra.mxu2 %v2560_v1  ;;  %2569 = vmatpush.bf16.msra.mxu3 %v2560_v1 }
  0x13   : > { %2474 = vmatmul.msk.bf16.vlgmr.msra.gmra.mxu0 %vm273_vm0, %v2556_v2  ;;  %2475 = vmatmul.msk.bf16.vlgmr.msra.gmra.mxu1 %vm273_vm0, %v2557_v3 }
  0x14   : > { %2476 = vmatmul.msk.bf16.vlgmr.msra.gmra.mxu2 %vm273_vm0, %v2558_v4  ;;  %2477 = vmatmul.msk.bf16.vlgmr.msra.gmra.mxu3 %vm273_vm0, %v2559_v5 }
  0x90   : > { %v295_v6 = vpop.f32.mrf.mxu0  ;;  %v300_v7 = vpop.f32.mrf.mxu1 }
  0x91   : > { %v2858_v8 = vpack.c.bf16 %v300_v7, %v300_v7  ;;  %v2880_v24 = vpack.c.bf16 %v295_v6, %v295_v6 }
  0x93   : > { %v374_v9 = vunpack.c.l.b16 %v2858_v8  ;;  %v325_v29 = vunpack.c.l.b16 %v2880_v24 }
  0x95   : > { %v2861_v10 = vpack.c.b16 %v374_v9, %v374_v9  ;;  %v2901_v35 = vpack.c.b16 %v325_v29, %v325_v29 }
  0x97   : > { %376 = vrot.lane.b32.xlu1 %v2861_v10, %s2790_s29  ;;  %v305_v11 = vpop.f32.mrf.mxu2  ;;  %v310_v12 = vpop.f32.mrf.mxu3 }
  0x98   : > { %v297_v13 = vpop.f32.mrf.mxu0  ;;  %v302_v14 = vpop.f32.mrf.mxu1  ;;  %v2865_v15 = vpack.c.bf16 %v305_v11, %v305_v11  ;;  %v2895_v32 = vpack.c.bf16 %v310_v12, %v310_v12  ;;  %v2977_v12 = vld [vmem:[%s3631_s4] sm:$0xff] }
  0x99   : > { %v2867_v16 = vpack.c.bf16 %v297_v13, %v297_v13  ;;  %v2869_v17 = vpack.c.bf16 %v302_v14, %v302_v14 }
  0x9a   : > { %v422_v18 = vunpack.c.l.b16 %v2865_v15  ;;  %v470_v36 = vunpack.c.l.b16 %v2895_v32 }
  0x9b   : > { %v350_v19 = vunpack.c.l.b16 %v2867_v16  ;;  %v398_v20 = vunpack.c.l.b16 %v2869_v17 }
  0x9c   : > { %v2874_v21 = vpack.c.b16 %v422_v18, %v422_v18  ;;  %v2910_v37 = vpack.c.b16 %v470_v36, %v470_v36 }
  0x9d   : > { %v2876_v22 = vpack.c.b16 %v350_v19, %v350_v19  ;;  %v2878_v23 = vpack.c.b16 %v398_v20, %v398_v20 }
  0x9f   : > { %424 = vrot.lane.b32.xlu1 %v2874_v21, %s2790_s29  ;;  %400 = vrot.lane.b32.xlu2 %v2878_v23, %s2790_s29  ;;  %v307_v25 = vpop.f32.mrf.mxu2  ;;  %v312_v26 = vpop.f32.mrf.mxu3 }
  0xa0   : > { %352 = vrot.lane.b32.xlu0 %v2876_v22, %s2790_s29  ;;  %v2888_v27 = vpack.c.bf16 %v307_v25, %v307_v25  ;;  %v2890_v28 = vpack.c.bf16 %v312_v26, %v312_v26 }
  0xa2   : > { %v446_v30 = vunpack.c.l.b16 %v2888_v27  ;;  %v494_v31 = vunpack.c.l.b16 %v2890_v28 }
  0xa4   : > { %v2897_v33 = vpack.c.b16 %v446_v30, %v446_v30  ;;  %v2899_v34 = vpack.c.b16 %v494_v31, %v494_v31 }
  0xa7   : > { %448 = vrot.lane.b32.xlu1 %v2897_v33, %s2790_s29  ;;  %496 = vrot.lane.b32.xlu2 %v2899_v34, %s2790_s29 }
  0xa8   : > { %327 = vrot.lane.b32.xlu0 %v2901_v35, %s2790_s29 }
  0xaf   : > { %693 = vrot.lane.b32.xlu2 %v2878_v23, %s2791_s30  ;;  %629 = vrot.lane.b32.xlu1 %v2901_v35, %s2791_s30 }
  0xb0   : > { %472 = vrot.lane.b32.xlu0 %v2910_v37, %s2790_s29 }
  0xb7   : > { %756 = vrot.lane.b32.xlu1 %v2910_v37, %s2791_s30  ;;  %651 = vrot.lane.b32.xlu2 %v2876_v22, %s2791_s30 }
  0xb8   : > { %672 = vrot.lane.b32.xlu0 %v2861_v10, %s2791_s30 }
  0xbf   : > { %846 = vrot.lane.b32.xlu1 %v2861_v10, %s2792_s6  ;;  %714 = vrot.lane.b32.xlu2 %v2874_v21, %s2791_s30 }
  0xc0   : > { %869 = vrot.lane.b32.xlu0 %v2878_v23, %s2792_s6 }
  0xc7   : > { %800 = vrot.lane.b32.xlu1 %v2901_v35, %s2792_s6  ;;  %867 = vrot.lane.b32.xlu2 %v2878_v23, %s2793_s7 }
  0xc8   : > { %823 = vrot.lane.b32.xlu0 %v2876_v22, %s2792_s6 }
  0xcf   : > { %844 = vrot.lane.b32.xlu1 %v2861_v10, %s2793_s7 }
  0xd0   : > { %777 = vrot.lane.b32.xlu0 %v2899_v34, %s2791_s30 }
  0xd8   : > { %735 = vrot.lane.b32.xlu0 %v2897_v33, %s2791_s30 }
  0xf9   : > { %v401_v38 = vpop.permute.xlu2 %400 }
  0xfa   : > { %v406_v55 = vsel %vm329_vm1, %v401_v38, 0 }
 0x101   : > { %v497_v39 = vpop.permute.xlu2 %496 }
 0x102   : > { %v502_v48 = vsel %vm329_vm1, %v497_v39, 0 }
 0x109   : > { %v377_v40 = vpop.permute.xlu1 %376  ;;  %v694_v41 = vpop.permute.xlu2 %693 }
 0x10a   : > { %v382_v42 = vsel %vm329_vm1, %v377_v40, 0  ;;  %v699_v59 = vsel %vm634_vm2, %v694_v41, 0 }
 0x10b   : > { %391 = vmatpush.bf16.xpose.msrb.mxu3 %v382_v42 }
 0x111   : > { %v425_v43 = vpop.permute.xlu1 %424  ;;  %v652_v44 = vpop.permute.xlu2 %651 }
 0x112   : > { %v430_v45 = vsel %vm329_vm1, %v425_v43, 0  ;;  %v353_v46 = vpop.permute.xlu0 %352  ;;  %2480 = vmatmul.msk.bf16.vlgmr.msrb.gmra.mxu3 %vm329_vm1, %v2858_v8  ;;  %v657_v2 = vsel %vm634_vm2, %v652_v44, 0 }
 0x113   : > { %v358_v47 = vsel %vm329_vm1, %v353_v46, 0 }
 0x114   : > { %367 = vmatpush.bf16.xpose.msrb.mxu2 %v358_v47 }
 0x119   : > { %v449_v49 = vpop.permute.xlu1 %448  ;;  %v715_v50 = vpop.permute.xlu2 %714 }
 0x11a   : > { %v454_v51 = vsel %vm329_vm1, %v449_v49, 0  ;;  %v328_v52 = vpop.permute.xlu0 %327  ;;  %v720_v53 = vsel %vm634_vm2, %v715_v50, 0 }
 0x11b   : > { %2479 = vmatmul.msk.bf16.vlgmr.msrb.gmra.mxu2 %vm329_vm1, %v2867_v16  ;;  %v334_v54 = vsel %vm329_vm1, %v328_v52, 0  ;;  %463 = vmatpush.bf16.xpose.msra.mxu3 %v454_v51 }
 0x11c   : > { %439 = vmatpush.bf16.xpose.msra.mxu2 %v430_v45  ;;  %343 = vmatpush.bf16.xpose.msrb.mxu1 %v334_v54 }
 0x11d   : > { %729 = vmatpush.bf16.msrb.mxu0 %v720_v53 }
 0x121   : > { %v630_v56 = vpop.permute.xlu1 %629 }
 0x122   : > { %v636_v57 = vsel %vm634_vm2, %v630_v56, 0  ;;  %v473_v58 = vpop.permute.xlu0 %472  ;;  %2483 = vmatmul.msk.bf16.vlgmr.msra.gmra.mxu3 %vm329_vm1, %v2888_v27 }
 0x123   : > { %v478_v60 = vsel %vm329_vm1, %v473_v58, 0  ;;  %2478 = vmatmul.msk.bf16.vlgmr.msrb.gmra.mxu1 %vm329_vm1, %v2880_v24  ;;  %645 = vmatpush.bf16.msrb.mxu3 %v636_v57 }
 0x124   : > { %511 = vmatpush.bf16.xpose.msrb.mxu2 %v502_v48  ;;  %415 = vmatpush.bf16.xpose.msra.mxu1 %v406_v55 }
 0x127   : > { %708 = vmatpush.bf16.msra.mxu3 %v699_v59 }
 0x129   : > { %v757_v61 = vpop.permute.xlu1 %756 }
 0x12a   : > { %v673_v62 = vpop.permute.xlu0 %672  ;;  %v762_v3 = vsel %vm634_vm2, %v757_v61, 0  ;;  %v3000_v61 = vpop.permute.xlu2 %867 }
 0x12b   : > { %v678_v63 = vsel %vm634_vm2, %v673_v62, 0  ;;  %2482 = vmatmul.msk.bf16.vlgmr.msra.gmra.mxu2 %vm329_vm1, %v2865_v15 }
 0x12c   : > { %487 = vmatpush.bf16.xpose.msrb.mxu1 %v478_v60  ;;  %687 = vmatpush.bf16.msra.mxu2 %v678_v63 }
 0x131   : > { %v2956_v0 = vpop.permute.xlu1 %846 }
 0x132   : > { %v2958_v1 = vpop.permute.xlu0 %869 }
 0x133   : > { %2481 = vmatmul.msk.bf16.vlgmr.msra.gmra.mxu1 %vm329_vm1, %v2869_v17 }
 0x134   : > { %666 = vmatpush.bf16.msra.mxu1 %v657_v2 }
 0x139   : > { %v801_v4 = vpop.permute.xlu1 %800 }
 0x13a   : > { %v806_v5 = vsel %vm329_vm1, %v801_v4, 0  ;;  %v2965_v6 = vpop.permute.xlu0 %823 }
 0x13b   : > { %2485 = vmatmul.msk.bf16.vlgmr.msrb.gmra.mxu2 %vm329_vm1, %v2890_v28  ;;  %815 = vmatpush.bf16.xpose.msra.mxu0 %v806_v5 }
 0x13c   : > { %771 = vmatpush.bf16.msrb.mxu2 %v762_v3 }
 0x142   : > { %v2969_v7 = vpop.permute.xlu0 %777 }
 0x143   : > { %2484 = vmatmul.msk.bf16.vlgmr.msrb.gmra.mxu1 %vm329_vm1, %v2895_v32 }
 0x14a   : > { %v736_v8 = vpop.permute.xlu0 %735 }
 0x14b   : > { %v741_v9 = vsel %vm634_vm2, %v736_v8, 0  ;;  %v3006_v8 = vpop.permute.xlu1 %844 }
 0x14c   : > { %750 = vmatpush.bf16.msrb.mxu1 %v741_v9 }
 0x195   : > { %v393_v11 = vpop.f32.mrf.mxu3 }
 0x196   : > { %v519_v13 = vmul.f32 0.17677669, %v393_v11 }
 0x198   : > { %v527_v14 = vadd.f32 %v519_v13, %v2977_v12 }
 0x19a   : > { %v539_v15 = vsel %vm329_vm1, %v527_v14, -inf }
 0x19b   : > { %540 = vmax.xlane.f32.xlu0 %v539_v15 }
 0x19d   : > { %v395_v16 = vpop.f32.mrf.mxu3 }
 0x19e   : > { %v369_v17 = vpop.f32.mrf.mxu2 }
 0x19f   : > { %v518_v24 = vmul.f32 0.17677669, %v369_v17 }
 0x1a0   : > { %v345_v18 = vpop.f32.mrf.mxu1 }
 0x1a1   : > { %v517_v19 = vmul.f32 0.17677669, %v345_v18  ;;  %v526_v29 = vadd.f32 %v518_v24, %v2977_v12 }
 0x1a3   : > { %v525_v20 = vadd.f32 %v517_v19, %v2977_v12  ;;  %v536_v32 = vsel %vm329_vm1, %v526_v29, -inf }
 0x1a5   : > { %v465_v25 = vpop.f32.mrf.mxu3  ;;  %v533_v26 = vsel %vm329_vm1, %v525_v20, -inf }
 0x1a6   : > { %v371_v27 = vpop.f32.mrf.mxu2  ;;  %534 = vmax.xlane.f32.xlu2 %v533_v26  ;;  %v522_v30 = vmul.f32 0.17677669, %v465_v25 }
 0x1a8   : > { %v347_v28 = vpop.f32.mrf.mxu1  ;;  %v530_v40 = vadd.f32 %v522_v30, %v2977_v12 }
 0x1aa   : > { %v548_v43 = vsel %vm329_vm1, %v530_v40, -inf }
 0x1ad   : > { %v467_v31 = vpop.f32.mrf.mxu3 }
 0x1ae   : > { %v441_v36 = vpop.f32.mrf.mxu2  ;;  %537 = vmax.xlane.f32.xlu2 %v536_v32 }
 0x1af   : > { %v521_v42 = vmul.f32 0.17677669, %v441_v36 }
 0x1b0   : > { %v417_v38 = vpop.f32.mrf.mxu1 }
 0x1b1   : > { %v520_v39 = vmul.f32 0.17677669, %v417_v38  ;;  %v2990_v47 = vadd.f32 %v521_v42, %v2977_v12 }
 0x1b3   : > { %v528_v41 = vadd.f32 %v520_v39, %v2977_v12  ;;  %v545_v48 = vsel %vm329_vm1, %v2990_v47, -inf }
 0x1b5   : > { %v542_v44 = vsel %vm329_vm1, %v528_v41, -inf }
 0x1b6   : > { %v443_v45 = vpop.f32.mrf.mxu2  ;;  %549 = vmax.xlane.f32.xlu2 %v548_v43  ;;  %543 = vmax.xlane.f32.xlu1 %v542_v44 }
 0x1b8   : > { %v419_v46 = vpop.f32.mrf.mxu1 }
 0x1be   : > { %v513_v49 = vpop.f32.mrf.mxu2  ;;  %546 = vmax.xlane.f32.xlu1 %v545_v48 }
 0x1bf   : > { %v524_v50 = vmul.f32 0.17677669, %v513_v49 }
 0x1c0   : > { %v489_v51 = vpop.f32.mrf.mxu1 }
 0x1c1   : > { %v523_v52 = vmul.f32 0.17677669, %v489_v51  ;;  %v532_v53 = vadd.f32 %v524_v50, %v2977_v12 }
 0x1c3   : > { %v554_v54 = vsel %vm329_vm1, %v532_v53, -inf  ;;  %v531_v55 = vadd.f32 %v523_v52, %v2977_v12 }
 0x1c4   : > { %555 = vmax.xlane.f32.xlu0 %v554_v54 }
 0x1c5   : > { %v551_v56 = vsel %vm329_vm1, %v531_v55, -inf }
 0x1c6   : > { %v515_v57 = vpop.f32.mrf.mxu2  ;;  %552 = vmax.xlane.f32.xlu2 %v551_v56 }
 0x1c8   : > { %v491_v58 = vpop.f32.mrf.mxu1 }
 0x1d7   : > { %821 = vrot.lane.b32.xlu1 %v2876_v22, %s2793_s7 }
 0x20e   : > { %v541_v59 = vpop.xlane.xlu0 %540 }
 0x20f   : > { %v559_v60 = vsub.f32 %v527_v14, %v541_v59 }
 0x211   : > { %v569_v62 = vmul.f32 1.442695, %v559_v60 }
 0x213   : > { %2653 = vpow2.f32 %v569_v62 }
 0x219   : > { %v3002_v63 = vpop.eup %2653  ;;  %v535_v2 = vpop.xlane.xlu2 %534 }
 0x21a   : > { %v557_v3 = vsub.f32 %v525_v20, %v535_v2  ;;  %v587_v4 = vsel %vm329_vm1, %v3002_v63, 0.0 }
 0x21b   : > { %588 = vadd.xlane.f32.xlu2 %v587_v4 }
 0x21c   : > { %v565_v5 = vmul.f32 1.442695, %v557_v3 }
 0x21e   : > { %2655 = vpow2.f32 %v565_v5  ;;  %v829_v5 = vsel %vm329_vm1, %v2965_v6, 0 }
 0x221   : > { %v538_v9 = vpop.xlane.xlu2 %537 }
 0x222   : > { %v558_v11 = vsub.f32 %v526_v29, %v538_v9 }
 0x224   : > { %v3008_v13 = vpop.eup %2655  ;;  %v567_v14 = vmul.f32 1.442695, %v558_v11 }
 0x225   : > { %v581_v15 = vsel %vm329_vm1, %v3008_v13, 0.0 }
 0x226   : > { %2657 = vpow2.f32 %v567_v14  ;;  %582 = vadd.xlane.f32.xlu0 %v581_v15  ;;  %v875_v14 = vsel %vm329_vm1, %v2958_v1, 0 }
 0x229   : > { %v550_v16 = vpop.xlane.xlu2 %549  ;;  %v544_v17 = vpop.xlane.xlu1 %543 }
 0x22a   : > { %v562_v18 = vsub.f32 %v530_v40, %v550_v16  ;;  %v560_v19 = vsub.f32 %v528_v41, %v544_v17 }
 0x22c   : > { %v3012_v20 = vpop.eup %2657  ;;  %v575_v24 = vmul.f32 1.442695, %v562_v18  ;;  %v571_v25 = vmul.f32 1.442695, %v560_v19 }
 0x22d   : > { %v584_v26 = vsel %vm329_vm1, %v3012_v20, 0.0 }
 0x22e   : > { %2659 = vpow2.f32 %v575_v24  ;;  %585 = vadd.xlane.f32.xlu2 %v584_v26 }
 0x22f   : > { %2661 = vpow2.f32 %v571_v25 }
 0x231   : > { %v547_v40 = vpop.xlane.xlu1 %546 }
 0x232   : > { %v561_v41 = vsub.f32 %v2990_v47, %v547_v40 }
 0x234   : > { %v3016_v27 = vpop.eup %2659  ;;  %v573_v43 = vmul.f32 1.442695, %v561_v41 }
 0x235   : > { %v3018_v28 = vpop.eup %2661  ;;  %v596_v29 = vsel %vm329_vm1, %v3016_v27, 0.0 }
 0x236   : > { %597 = vadd.xlane.f32.xlu1 %v596_v29  ;;  %v590_v30 = vsel %vm329_vm1, %v3018_v28, 0.0 }
 0x237   : > { %591 = vadd.xlane.f32.xlu0 %v590_v30  ;;  %v556_v42 = vpop.xlane.xlu0 %555 }
 0x238   : > { %v564_v44 = vsub.f32 %v532_v53, %v556_v42 }
 0x239   : > { %v553_v31 = vpop.xlane.xlu2 %552 }
 0x23a   : > { %v563_v32 = vsub.f32 %v531_v55, %v553_v31  ;;  %v579_v45 = vmul.f32 1.442695, %v564_v44  ;;  %v852_v55 = vsel %vm329_vm1, %v2956_v0, 0  ;;  %v783_v0 = vsel %vm634_vm2, %v2969_v7, 0 }
 0x23c   : > { %v577_v36 = vmul.f32 1.442695, %v563_v32 }
 0x23e   : > { %2663 = vpow2.f32 %v577_v36 }
 0x23f   : > { %2665 = vpow2.f32 %v573_v43 }
 0x240   : > { %2667 = vpow2.f32 %v579_v45 }
 0x244   : > { %v3024_v38 = vpop.eup %2663 }
 0x245   : > { %v599_v39 = vsel %vm329_vm1, %v3024_v38, 0.0  ;;  %v3037_v46 = vpop.eup %2665 }
 0x246   : > { %600 = vadd.xlane.f32.xlu1 %v599_v39  ;;  %938 = vrot.lane.b32.xlu2 %v2910_v37, %s2792_s6  ;;  %v593_v48 = vsel %vm329_vm1, %v3037_v46, 0.0  ;;  %v3043_v47 = vpop.eup %2667 }
 0x247   : > { %v602_v49 = vsel %vm329_vm1, %v3043_v47, 0.0 }
 0x249   : > { %v822_v59 = vpop.permute.xlu1 %821 }
 0x24b   : > { %798 = vrot.lane.b32.xlu0 %v2901_v35, %s2793_s7 }
 0x25f   : > { %892 = vrot.lane.b32.xlu1 %v2874_v21, %s2792_s6 }
 0x267   : > { %959 = vrot.lane.b32.xlu1 %v2899_v34, %s2793_s7 }
 0x26f   : > { %1136 = vrot.lane.b32.xlu1 %v2861_v10, %s2794_s10  ;;  %594 = vadd.xlane.f32.xlu2 %v593_v48 }
 0x275   : > { %603 = vadd.xlane.f32.xlu0 %v602_v49 }
 0x277   : > { %1115 = vrot.lane.b32.xlu1 %v2876_v22, %s2794_s10 }
 0x27f   : > { %1241 = vrot.lane.b32.xlu1 %v2899_v34, %s2794_s10 }
 0x287   : > { %915 = vrot.lane.b32.xlu2 %v2897_v33, %s2792_s6 }
 0x289   : > { %961 = vrot.lane.b32.xlu0 %v2899_v34, %s2792_s6 }
 0x28e   : > { %v589_v50 = vpop.xlane.xlu2 %588 }
 0x28f   : > { %890 = vrot.lane.b32.xlu2 %v2874_v21, %s2793_s7  ;;  %2669 = vrcp.f32 %v589_v50 }
 0x291   : > { %936 = vrot.lane.b32.xlu0 %v2910_v37, %s2793_s7 }
 0x295   : > { %v2670_v51 = vpop.eup %2669 }
 0x296   : > { %v615_v52 = vmul.f32 %v2670_v51, %v3002_v63 }
 0x297   : > { %1157 = vrot.lane.b32.xlu2 %v2878_v23, %s2794_s10 }
 0x298   : > { %v623_v53 = vpack.c.bf16 %v615_v52, %v615_v52 }
 0x299   : > { %913 = vrot.lane.b32.xlu0 %v2897_v33, %s2793_s7  ;;  %v583_v54 = vpop.xlane.xlu0 %582 }
 0x29a   : > { %2671 = vrcp.f32 %v583_v54  ;;  %2488 = vmatmul.msk.bf16.vlgmr.msra.gmra.mxu2 %vm329_vm1, %v623_v53 }
 0x29b   : > { %861 = vmatpush.bf16.xpose.msra.mxu2 %v852_v55 }
 0x29f   : > { %1220 = vrot.lane.b32.xlu2 %v2910_v37, %s2794_s10 }
 0x2a0   : > { %v2672_v56 = vpop.eup %2671 }
 0x2a1   : > { %v613_v57 = vmul.f32 %v2672_v56, %v3008_v13  ;;  %1094 = vrot.lane.b32.xlu0 %v2901_v35, %s2794_s10  ;;  %v586_v58 = vpop.xlane.xlu2 %585 }
 0x2a2   : > { %2673 = vrcp.f32 %v586_v58 }
 0x2a3   : > { %v621_v60 = vpack.c.bf16 %v613_v57, %v613_v57 }
 0x2a5   : > { %2486 = vmatmul.msk.bf16.vlgmr.msrb.gmra.mxu3 %vm329_vm1, %v621_v60 }
 0x2a6   : > { %792 = vmatpush.bf16.msrb.mxu3 %v783_v0 }
 0x2a7   : > { %1199 = vrot.lane.b32.xlu2 %v2897_v33, %s2794_s10 }
 0x2a8   : > { %v2674_v62 = vpop.eup %2673 }
 0x2a9   : > { %v614_v63 = vmul.f32 %v2674_v62, %v3012_v20  ;;  %1178 = vrot.lane.b32.xlu0 %v2874_v21, %s2794_s10  ;;  %v598_v4 = vpop.xlane.xlu1 %597  ;;  %v939_v19 = vpop.permute.xlu2 %938 }
 0x2aa   : > { %v592_v2 = vpop.xlane.xlu0 %591  ;;  %v944_v24 = vsel %vm329_vm1, %v939_v19, 0 }
 0x2ab   : > { %v622_v3 = vpack.c.bf16 %v614_v63, %v614_v63  ;;  %2675 = vrcp.f32 %v592_v2 }
 0x2ac   : > { %2677 = vrcp.f32 %v598_v4 }
 0x2ad   : > { %2487 = vmatmul.msk.bf16.vlgmr.msra.gmra.mxu1 %vm329_vm1, %v622_v3 }
 0x2ae   : > { %838 = vmatpush.bf16.xpose.msra.mxu1 %v829_v5 }
 0x2af   : > { %1264 = vrot.lane.b32.xlu2 %v2901_v35, %s2795_s11 }
 0x2b1   : > { %v2676_v7 = vpop.eup %2675  ;;  %1310 = vrot.lane.b32.xlu0 %v2861_v10, %s2795_s11 }
 0x2b2   : > { %v616_v9 = vmul.f32 %v2676_v7, %v3018_v28  ;;  %v2678_v11 = vpop.eup %2677 }
 0x2b3   : > { %v618_v6 = vmul.f32 %v2678_v11, %v3016_v27 }
 0x2b4   : > { %v624_v13 = vpack.c.bf16 %v616_v9, %v616_v9 }
 0x2b5   : > { %v626_v16 = vpack.c.bf16 %v618_v6, %v618_v6 }
 0x2b6   : > { %2489 = vmatmul.msk.bf16.vlgmr.msra.gmra.mxu3 %vm329_vm1, %v624_v13 }
 0x2b7   : > { %884 = vmatpush.bf16.xpose.msra.mxu3 %v875_v14 }
 0x2b9   : > { %v601_v15 = vpop.xlane.xlu1 %600 }
 0x2ba   : > { %2679 = vrcp.f32 %v601_v15 }
 0x2bd   : > { %2491 = vmatmul.msk.bf16.vlgmr.msrb.gmra.mxu1 %vm329_vm1, %v626_v16  ;;  %v799_v26 = vpop.permute.xlu0 %798 }
 0x2c0   : > { %v2680_v17 = vpop.eup %2679 }
 0x2c1   : > { %v619_v18 = vmul.f32 %v2680_v17, %v3024_v38 }
 0x2c3   : > { %v627_v20 = vpack.c.bf16 %v619_v18, %v619_v18 }
 0x2c5   : > { %2492 = vmatmul.msk.bf16.vlgmr.msrb.gmra.mxu2 %vm329_vm1, %v627_v20 }
 0x2c6   : > { %953 = vmatpush.bf16.xpose.msrb.mxu2 %v944_v24 }
 0x2cd   : > { %2495 = vmatmul.msk.bf16.vlgmr.msra.gmra.mxu1 %vm329_vm1, %v822_v59 }
 0x2d1   : > { %v893_v1 = vpop.permute.xlu1 %892 }
 0x2d2   : > { %v898_v41 = vsel %vm329_vm1, %v893_v1, 0 }
 0x2d5   : > { %2496 = vmatmul.msk.bf16.vlgmr.msra.gmra.mxu2 %vm329_vm1, %v3006_v8 }
 0x2d9   : > { %v960_v25 = vpop.permute.xlu1 %959 }
 0x2e1   : > { %v1137_v27 = vpop.permute.xlu1 %1136 }
 0x2e2   : > { %v1142_v28 = vsel %vm634_vm2, %v1137_v27, 0  ;;  %v595_v29 = vpop.xlane.xlu2 %594 }
 0x2e3   : > { %2681 = vrcp.f32 %v595_v29  ;;  %1151 = vmatpush.bf16.msra.mxu2 %v1142_v28 }
 0x2e8   : > { %v604_v30 = vpop.xlane.xlu0 %603 }
 0x2e9   : > { %v2682_v31 = vpop.eup %2681  ;;  %2683 = vrcp.f32 %v604_v30  ;;  %v1116_v32 = vpop.permute.xlu1 %1115 }
 0x2ea   : > { %v617_v36 = vmul.f32 %v2682_v31, %v3037_v46  ;;  %v916_v38 = vpop.permute.xlu2 %915  ;;  %v1121_v40 = vsel %vm634_vm2, %v1116_v32, 0 }
 0x2eb   : > { %v921_v39 = vsel %vm329_vm1, %v916_v38, 0 }
 0x2ec   : > { %930 = vmatpush.bf16.xpose.msrb.mxu1 %v921_v39  ;;  %v625_v8 = vpack.c.bf16 %v617_v36, %v617_v36 }
 0x2ee   : > { %2490 = vmatmul.msk.bf16.vlgmr.msrb.gmra.mxu0 %vm329_vm1, %v625_v8 }
 0x2ef   : > { %v2684_v42 = vpop.eup %2683  ;;  %907 = vmatpush.bf16.xpose.msrb.mxu0 %v898_v41 }
 0x2f0   : > { %v620_v43 = vmul.f32 %v2684_v42, %v3043_v47 }
 0x2f1   : > { %v1242_v56 = vpop.permute.xlu1 %1241 }
 0x2f2   : > { %v628_v44 = vpack.c.bf16 %v620_v43, %v620_v43  ;;  %v891_v45 = vpop.permute.xlu2 %890  ;;  %v1247_v58 = vsel %vm634_vm2, %v1242_v56, 0 }
 0x2f4   : > { %1130 = vmatpush.bf16.msra.mxu1 %v1121_v40  ;;  %2493 = vmatmul.msk.bf16.vlgmr.msrb.gmra.mxu3 %vm329_vm1, %v628_v44 }
 0x2fa   : > { %v1158_v46 = vpop.permute.xlu2 %1157 }
 0x2fb   : > { %v962_v48 = vpop.permute.xlu0 %961  ;;  %v1163_v53 = vsel %vm634_vm2, %v1158_v46, 0 }
 0x2fc   : > { %v967_v49 = vsel %vm329_vm1, %v962_v48, 0 }
 0x2fd   : > { %976 = vmatpush.bf16.xpose.msrb.mxu3 %v967_v49 }
 0x2fe   : > { %2494 = vmatmul.msk.bf16.vlgmr.msra.gmra.mxu0 %vm329_vm1, %v799_v26 }
 0x302   : > { %v1221_v50 = vpop.permute.xlu2 %1220 }
 0x303   : > { %v1226_v51 = vsel %vm634_vm2, %v1221_v50, 0  ;;  %v937_v52 = vpop.permute.xlu0 %936 }
 0x304   : > { %2497 = vmatmul.msk.bf16.vlgmr.msra.gmra.mxu3 %vm329_vm1, %v3000_v61  ;;  %2500 = vmatmul.msk.bf16.vlgmr.msrb.gmra.mxu2 %vm329_vm1, %v937_v52 }
 0x305   : > { %1172 = vmatpush.bf16.msra.mxu3 %v1163_v53  ;;  %1235 = vmatpush.bf16.msrb.mxu2 %v1226_v51 }
 0x30a   : > { %v1200_v47 = vpop.permute.xlu2 %1199 }
 0x30b   : > { %v1205_v54 = vsel %vm634_vm2, %v1200_v47, 0  ;;  %v914_v55 = vpop.permute.xlu0 %913 }
 0x30c   : > { %2499 = vmatmul.msk.bf16.vlgmr.msrb.gmra.mxu1 %vm329_vm1, %v914_v55 }
 0x30d   : > { %1214 = vmatpush.bf16.msrb.mxu1 %v1205_v54 }
 0x30e   : > { %2498 = vmatmul.msk.bf16.vlgmr.msrb.gmra.mxu0 %vm329_vm1, %v891_v45 }
 0x313   : > { %v1095_v57 = vpop.permute.xlu0 %1094 }
 0x314   : > { %v1100_v59 = vsel %vm634_vm2, %v1095_v57, 0  ;;  %2501 = vmatmul.msk.bf16.vlgmr.msrb.gmra.mxu3 %vm329_vm1, %v960_v25 }
 0x315   : > { %1256 = vmatpush.bf16.msrb.mxu3 %v1247_v58  ;;  %1109 = vmatpush.bf16.msra.mxu0 %v1100_v59 }
 0x31b   : > { %v1179_v61 = vpop.permute.xlu0 %1178 }
 0x31c   : > { %v1184_v60 = vsel %vm634_vm2, %v1179_v61, 0 }
 0x31d   : > { %1193 = vmatpush.bf16.msrb.mxu0 %v1184_v60  ;;  %v3121_v0 = vpop.f32.mrf.mxu2 }
 0x325   : > { %v691_v62 = vpop.f32.mrf.mxu2 }
 0x328   : > { %v3123_v63 = vpop.f32.mrf.mxu3 }
 0x32a   : > { %v3125_v2 = vpop.f32.mrf.mxu1 }
 0x330   : > { %v649_v3 = vpop.f32.mrf.mxu3 }
 0x332   : > { %v670_v4 = vpop.f32.mrf.mxu1 }
 0x339   : > { %v3127_v5 = vpop.f32.mrf.mxu3 }
 0x33a   : > { %v3129_v7 = vpop.f32.mrf.mxu1 }
 0x341   : > { %v712_v9 = vpop.f32.mrf.mxu3 }
 0x342   : > { %v754_v11 = vpop.f32.mrf.mxu1 }
 0x348   : > { %v3131_v13 = vpop.f32.mrf.mxu2 }
 0x34a   : > { %v840_v14 = vpop.f32.mrf.mxu1 }
 0x34b   : > { %v983_v6 = vmul.f32 0.17677669, %v840_v14 }
 0x34d   : > { %v991_v15 = vadd.f32 %v983_v6, %v2977_v12 }
 0x34f   : > { %v1001_v16 = vsel %vm329_vm1, %v991_v15, -inf }
 0x350   : > { %v775_v17 = vpop.f32.mrf.mxu2  ;;  %1002 = vmax.xlane.f32.xlu1 %v1001_v16 }
 0x352   : > { %v842_v18 = vpop.f32.mrf.mxu1 }
 0x358   : > { %v863_v19 = vpop.f32.mrf.mxu2 }
 0x359   : > { %v984_v20 = vmul.f32 0.17677669, %v863_v19 }
 0x35b   : > { %v992_v24 = vadd.f32 %v984_v20, %v2977_v12  ;;  %v3168_v20 = vpop.permute.xlu0 %1310 }
 0x35d   : > { %v1004_v1 = vsel %vm329_vm1, %v992_v24, -inf }
 0x35e   : > { %1005 = vmax.xlane.f32.xlu1 %v1004_v1 }
 0x360   : > { %v865_v25 = vpop.f32.mrf.mxu2 }
 0x36b   : > { %v3137_v26 = vpop.f32.mrf.mxu0 }
 0x373   : > { %v733_v27 = vpop.f32.mrf.mxu0 }
 0x374   : > { %v3170_v27 = vpop.permute.xlu2 %1264 }
 0x377   : > { %v3139_v28 = vpop.f32.mrf.mxu3 }
 0x37b   : > { %v817_v29 = vpop.f32.mrf.mxu0 }
 0x37c   : > { %v982_v30 = vmul.f32 0.17677669, %v817_v29 }
 0x37e   : > { %v990_v31 = vadd.f32 %v982_v30, %v2977_v12 }
 0x37f   : > { %v796_v32 = vpop.f32.mrf.mxu3 }
 0x380   : > { %v998_v36 = vsel %vm329_vm1, %v990_v31, -inf }
 0x381   : > { %999 = vmax.xlane.f32.xlu0 %v998_v36 }
 0x383   : > { %v819_v38 = vpop.f32.mrf.mxu0 }
 0x387   : > { %v886_v39 = vpop.f32.mrf.mxu3  ;;  %v955_v40 = vpop.f32.mrf.mxu2 }
 0x388   : > { %v985_v45 = vmul.f32 0.17677669, %v886_v39  ;;  %v988_v54 = vmul.f32 0.17677669, %v955_v40 }
 0x389   : > { %v932_v8 = vpop.f32.mrf.mxu1 }
 0x38a   : > { %v987_v41 = vmul.f32 0.17677669, %v932_v8  ;;  %v993_v53 = vadd.f32 %v985_v45, %v2977_v12  ;;  %v3152_v57 = vadd.f32 %v988_v54, %v2977_v12 }
 0x38b   : > { %v909_v42 = vpop.f32.mrf.mxu0 }
 0x38c   : > { %v986_v43 = vmul.f32 0.17677669, %v909_v42  ;;  %v995_v44 = vadd.f32 %v987_v41, %v2977_v12  ;;  %v1007_v55 = vsel %vm329_vm1, %v993_v53, -inf  ;;  %v1016_v58 = vsel %vm329_vm1, %v3152_v57, -inf }
 0x38e   : > { %v1013_v46 = vsel %vm329_vm1, %v995_v44, -inf  ;;  %v994_v48 = vadd.f32 %v986_v43, %v2977_v12 }
 0x38f   : > { %v888_v49 = vpop.f32.mrf.mxu3  ;;  %v957_v50 = vpop.f32.mrf.mxu2  ;;  %1014 = vmax.xlane.f32.xlu2 %v1013_v46 }
 0x390   : > { %v1010_v51 = vsel %vm329_vm1, %v994_v48, -inf }
 0x391   : > { %v934_v52 = vpop.f32.mrf.mxu1  ;;  %1011 = vmax.xlane.f32.xlu1 %v1010_v51 }
 0x393   : > { %v911_v47 = vpop.f32.mrf.mxu0 }
 0x395   : > { %1287 = vrot.lane.b32.xlu0 %v2876_v22, %s2795_s11 }
 0x397   : > { %v978_v56 = vpop.f32.mrf.mxu3  ;;  %1008 = vmax.xlane.f32.xlu2 %v1007_v55 }
 0x398   : > { %v989_v61 = vmul.f32 0.17677669, %v978_v56 }
 0x39a   : > { %v997_v60 = vadd.f32 %v989_v61, %v2977_v12 }
 0x39c   : > { %v1019_v62 = vsel %vm329_vm1, %v997_v60, -inf }
 0x39f   : > { %v980_v59 = vpop.f32.mrf.mxu3  ;;  %1017 = vmax.xlane.f32.xlu2 %v1016_v58 }
 0x3aa   : > { %1333 = vrot.lane.b32.xlu1 %v2878_v23, %s2795_s11 }
 0x3bf   : > { %1020 = vmax.xlane.f32.xlu0 %v1019_v62 }
 0x3c3   : > { %v1003_v3 = vpop.xlane.xlu1 %1002 }
 0x3c4   : > { %v1023_v4 = vsub.f32 %v991_v15, %v1003_v3 }
 0x3c6   : > { %v1032_v9 = vmul.f32 1.442695, %v1023_v4 }
 0x3c8   : > { %2685 = vpow2.f32 %v1032_v9 }
 0x3ce   : > { %v3160_v11 = vpop.eup %2685 }
 0x3cf   : > { %v1049_v14 = vsel %vm329_vm1, %v3160_v11, 0.0 }
 0x3d0   : > { %1050 = vadd.xlane.f32.xlu0 %v1049_v14 }
 0x3d1   : > { %v1006_v6 = vpop.xlane.xlu1 %1005 }
 0x3d2   : > { %v1024_v16 = vsub.f32 %v992_v24, %v1006_v6  ;;  %v1316_v6 = vsel %vm329_vm1, %v3168_v20, 0 }
 0x3d4   : > { %v1034_v17 = vmul.f32 1.442695, %v1024_v16 }
 0x3d6   : > { %2687 = vpow2.f32 %v1034_v17 }
 0x3dc   : > { %v3164_v18 = vpop.eup %2687 }
 0x3dd   : > { %v1052_v19 = vsel %vm329_vm1, %v3164_v18, 0.0 }
 0x3de   : > { %1053 = vadd.xlane.f32.xlu0 %v1052_v19 }
 0x3f4   : > { %v1000_v15 = vpop.xlane.xlu0 %999 }
 0x3f5   : > { %v1022_v1 = vsub.f32 %v990_v31, %v1000_v15  ;;  %v1270_v15 = vsel %vm329_vm1, %v3170_v27, 0 }
 0x3f7   : > { %v1030_v25 = vmul.f32 1.442695, %v1022_v1 }
 0x3f9   : > { %2689 = vpow2.f32 %v1030_v25 }
 0x3ff   : > { %v3172_v29 = vpop.eup %2689 }
 0x400   : > { %v1046_v24 = vsel %vm329_vm1, %v3172_v29, 0.0 }
 0x401   : > { %1047 = vadd.xlane.f32.xlu2 %v1046_v24 }
 0x402   : > { %v1015_v30 = vpop.xlane.xlu2 %1014 }
 0x403   : > { %v1027_v32 = vsub.f32 %v995_v44, %v1015_v30 }
 0x404   : > { %v1012_v36 = vpop.xlane.xlu1 %1011 }
 0x405   : > { %v1040_v38 = vmul.f32 1.442695, %v1027_v32  ;;  %v1026_v39 = vsub.f32 %v994_v48, %v1012_v36 }
 0x407   : > { %2691 = vpow2.f32 %v1040_v38  ;;  %v1038_v40 = vmul.f32 1.442695, %v1026_v39  ;;  %v1288_v49 = vpop.permute.xlu0 %1287 }
 0x408   : > { %v1293_v62 = vsel %vm329_vm1, %v1288_v49, 0 }
 0x409   : > { %2693 = vpow2.f32 %v1038_v40 }
 0x40a   : > { %v1009_v8 = vpop.xlane.xlu2 %1008 }
 0x40b   : > { %v1025_v31 = vsub.f32 %v993_v53, %v1009_v8 }
 0x40d   : > { %v3176_v41 = vpop.eup %2691  ;;  %v1036_v42 = vmul.f32 1.442695, %v1025_v31 }
 0x40e   : > { %v1061_v43 = vsel %vm329_vm1, %v3176_v41, 0.0 }
 0x40f   : > { %v3180_v45 = vpop.eup %2693  ;;  %2695 = vpow2.f32 %v1036_v42  ;;  %1062 = vadd.xlane.f32.xlu0 %v1061_v43 }
 0x410   : > { %v1058_v44 = vsel %vm329_vm1, %v3180_v45, 0.0 }
 0x411   : > { %1059 = vadd.xlane.f32.xlu1 %v1058_v44 }
 0x412   : > { %v1018_v53 = vpop.xlane.xlu2 %1017 }
 0x413   : > { %v1028_v47 = vsub.f32 %v3152_v57, %v1018_v53 }
 0x415   : > { %v3184_v46 = vpop.eup %2695  ;;  %v1042_v56 = vmul.f32 1.442695, %v1028_v47 }
 0x416   : > { %v1055_v48 = vsel %vm329_vm1, %v3184_v46, 0.0 }
 0x419   : > { %1056 = vadd.xlane.f32.xlu1 %v1055_v48  ;;  %1331 = vrot.lane.b32.xlu2 %v2878_v23, %s2796_s12 }
 0x421   : > { %1402 = vrot.lane.b32.xlu2 %v2910_v37, %s2795_s11 }
 0x423   : > { %1262 = vrot.lane.b32.xlu0 %v2901_v35, %s2796_s12 }
 0x42b   : > { %1425 = vrot.lane.b32.xlu0 %v2899_v34, %s2795_s11 }
 0x432   : > { %1308 = vrot.lane.b32.xlu1 %v2861_v10, %s2796_s12  ;;  %v1021_v50 = vpop.xlane.xlu0 %1020 }
 0x433   : > { %v1029_v51 = vsub.f32 %v997_v60, %v1021_v50 }
 0x435   : > { %v1044_v52 = vmul.f32 1.442695, %v1029_v51 }
 0x437   : > { %2697 = vpow2.f32 %v1044_v52 }
 0x43a   : > { %1285 = vrot.lane.b32.xlu1 %v2876_v22, %s2796_s12 }
 0x43d   : > { %v3203_v55 = vpop.eup %2697 }
 0x43e   : > { %v1067_v58 = vsel %vm329_vm1, %v3203_v55, 0.0 }
 0x442   : > { %1356 = vrot.lane.b32.xlu1 %v2874_v21, %s2795_s11 }
 0x443   : > { %v1051_v54 = vpop.xlane.xlu0 %1050 }
 0x444   : > { %2699 = vrcp.f32 %v1051_v54 }
 0x445   : > { %2701 = vpow2.f32 %v1042_v56 }
 0x44a   : > { %v2700_v59 = vpop.eup %2699  ;;  %1423 = vrot.lane.b32.xlu1 %v2899_v34, %s2796_s12  ;;  %1068 = vadd.xlane.f32.xlu2 %v1067_v58 }
 0x44b   : > { %v1079_v61 = vmul.f32 %v2700_v59, %v3160_v11  ;;  %v3212_v57 = vpop.eup %2701 }
 0x44c   : > { %v1064_v4 = vsel %vm329_vm1, %v3212_v57, 0.0 }
 0x44d   : > { %v1087_v60 = vpack.c.bf16 %v1079_v61, %v1079_v61 }
 0x44f   : > { %2503 = vmatmul.msk.bf16.vlgmr.msra.gmra.mxu1 %vm329_vm1, %v1087_v60 }
 0x450   : > { %1302 = vmatpush.bf16.xpose.msra.mxu1 %v1293_v62 }
 0x451   : > { %v1054_v3 = vpop.xlane.xlu0 %1053 }
 0x452   : > { %2703 = vrcp.f32 %v1054_v3  ;;  %1579 = vrot.lane.b32.xlu1 %v2876_v22, %s2797_s13 }
 0x455   : > { %1065 = vadd.xlane.f32.xlu0 %v1064_v4 }
 0x458   : > { %v2704_v9 = vpop.eup %2703 }
 0x459   : > { %v1080_v11 = vmul.f32 %v2704_v9, %v3164_v18  ;;  %v1334_v18 = vpop.permute.xlu1 %1333 }
 0x45a   : > { %1642 = vrot.lane.b32.xlu1 %v2874_v21, %s2797_s13  ;;  %v1339_v31 = vsel %vm329_vm1, %v1334_v18, 0 }
 0x45b   : > { %v1088_v14 = vpack.c.bf16 %v1080_v11, %v1080_v11 }
 0x45d   : > { %2504 = vmatmul.msk.bf16.vlgmr.msra.gmra.mxu2 %vm329_vm1, %v1088_v14 }
 0x45e   : > { %1325 = vmatpush.bf16.xpose.msra.mxu2 %v1316_v6 }
 0x462   : > { %1705 = vrot.lane.b32.xlu1 %v2899_v34, %s2797_s13  ;;  %1379 = vrot.lane.b32.xlu2 %v2897_v33, %s2795_s11 }
 0x469   : > { %1400 = vrot.lane.b32.xlu0 %v2910_v37, %s2796_s12 }
 0x46a   : > { %1354 = vrot.lane.b32.xlu2 %v2874_v21, %s2796_s12 }
 0x471   : > { %1377 = vrot.lane.b32.xlu0 %v2897_v33, %s2796_s12 }
 0x472   : > { %1558 = vrot.lane.b32.xlu2 %v2901_v35, %s2797_s13 }
 0x474   : > { %v1048_v16 = vpop.xlane.xlu2 %1047 }
 0x475   : > { %2705 = vrcp.f32 %v1048_v16 }
 0x479   : > { %1600 = vrot.lane.b32.xlu0 %v2861_v10, %s2797_s13 }
 0x47a   : > { %1621 = vrot.lane.b32.xlu2 %v2878_v23, %s2797_s13 }
 0x47b   : > { %v2706_v17 = vpop.eup %2705 }
 0x47c   : > { %v1078_v19 = vmul.f32 %v2706_v17, %v3172_v29  ;;  %v1332_v43 = vpop.permute.xlu2 %1331 }
 0x47e   : > { %v1086_v20 = vpack.c.bf16 %v1078_v19, %v1078_v19 }
 0x480   : > { %2502 = vmatmul.msk.bf16.vlgmr.msra.gmra.mxu0 %vm329_vm1, %v1086_v20 }
 0x481   : > { %1684 = vrot.lane.b32.xlu0 %v2910_v37, %s2797_s13  ;;  %1279 = vmatpush.bf16.xpose.msra.mxu0 %v1270_v15 }
 0x482   : > { %v1063_v1 = vpop.xlane.xlu0 %1062  ;;  %1663 = vrot.lane.b32.xlu2 %v2897_v33, %s2797_s13 }
 0x483   : > { %2707 = vrcp.f32 %v1063_v1 }
 0x484   : > { %v1060_v25 = vpop.xlane.xlu1 %1059  ;;  %v1403_v48 = vpop.permute.xlu2 %1402 }
 0x485   : > { %2709 = vrcp.f32 %v1060_v25  ;;  %v1408_v11 = vsel %vm329_vm1, %v1403_v48, 0 }
 0x489   : > { %v2708_v24 = vpop.eup %2707  ;;  %1728 = vrot.lane.b32.xlu0 %v2901_v35, %s2798_s14 }
 0x48a   : > { %v1083_v29 = vmul.f32 %v2708_v24, %v3176_v41  ;;  %1751 = vrot.lane.b32.xlu2 %v2876_v22, %s2798_s14 }
 0x48b   : > { %v2710_v27 = vpop.eup %2709 }
 0x48c   : > { %v1091_v30 = vpack.c.bf16 %v1083_v29, %v1083_v29  ;;  %v1082_v32 = vmul.f32 %v2710_v27, %v3180_v45  ;;  %v1057_v36 = vpop.xlane.xlu1 %1056 }
 0x48d   : > { %2711 = vrcp.f32 %v1057_v36 }
 0x48e   : > { %v1090_v38 = vpack.c.bf16 %v1082_v32, %v1082_v32  ;;  %2507 = vmatmul.msk.bf16.vlgmr.msrb.gmra.mxu1 %vm329_vm1, %v1091_v30 }
 0x490   : > { %2506 = vmatmul.msk.bf16.vlgmr.msrb.gmra.mxu0 %vm329_vm1, %v1090_v38 }
 0x493   : > { %v2712_v39 = vpop.eup %2711 }
 0x494   : > { %v1081_v40 = vmul.f32 %v2712_v39, %v3184_v46 }
 0x495   : > { %v1263_v41 = vpop.permute.xlu0 %1262 }
 0x496   : > { %v1089_v8 = vpack.c.bf16 %v1081_v40, %v1081_v40 }
 0x498   : > { %2505 = vmatmul.msk.bf16.vlgmr.msra.gmra.mxu3 %vm329_vm1, %v1089_v8 }
 0x499   : > { %1348 = vmatpush.bf16.xpose.msra.mxu3 %v1339_v31 }
 0x49d   : > { %v1426_v51 = vpop.permute.xlu0 %1425 }
 0x49e   : > { %v1431_v60 = vsel %vm329_vm1, %v1426_v51, 0 }
 0x4a0   : > { %2510 = vmatmul.msk.bf16.vlgmr.msra.gmra.mxu0 %vm329_vm1, %v1263_v41 }
 0x4a4   : > { %v1309_v42 = vpop.permute.xlu1 %1308 }
 0x4ac   : > { %v1286_v45 = vpop.permute.xlu1 %1285 }
 0x4ad   : > { %2511 = vmatmul.msk.bf16.vlgmr.msra.gmra.mxu1 %vm329_vm1, %v1286_v45 }
 0x4b4   : > { %v1357_v44 = vpop.permute.xlu1 %1356 }
 0x4b5   : > { %v1362_v49 = vsel %vm329_vm1, %v1357_v44, 0 }
 0x4b6   : > { %1371 = vmatpush.bf16.xpose.msrb.mxu0 %v1362_v49 }
 0x4bc   : > { %v1424_v46 = vpop.permute.xlu1 %1423 }
 0x4bd   : > { %v1069_v50 = vpop.xlane.xlu2 %1068 }
 0x4be   : > { %2713 = vrcp.f32 %v1069_v50 }
 0x4c4   : > { %v2714_v52 = vpop.eup %2713  ;;  %v1580_v53 = vpop.permute.xlu1 %1579 }
 0x4c5   : > { %v1085_v47 = vmul.f32 %v2714_v52, %v3203_v55  ;;  %v1380_v54 = vpop.permute.xlu2 %1379  ;;  %v1585_v59 = vsel %vm634_vm2, %v1580_v53, 0 }
 0x4c6   : > { %v1385_v56 = vsel %vm329_vm1, %v1380_v54, 0 }
 0x4c7   : > { %v1093_v58 = vpack.c.bf16 %v1085_v47, %v1085_v47  ;;  %1394 = vmatpush.bf16.xpose.msrb.mxu1 %v1385_v56 }
 0x4c8   : > { %v1066_v61 = vpop.xlane.xlu0 %1065 }
 0x4c9   : > { %2715 = vrcp.f32 %v1066_v61  ;;  %2509 = vmatmul.msk.bf16.vlgmr.msrb.gmra.mxu3 %vm329_vm1, %v1093_v58  ;;  %v3298_v58 = vld [vmem:[%s3631_s4] sm:$0xff] }
 0x4ca   : > { %1440 = vmatpush.bf16.xpose.msrb.mxu3 %v1431_v60 }
 0x4cc   : > { %v3259_v62 = vpop.f32.mrf.mxu1  ;;  %v1643_v14 = vpop.permute.xlu1 %1642 }
 0x4cd   : > { %v1355_v3 = vpop.permute.xlu2 %1354  ;;  %v1648_v18 = vsel %vm634_vm2, %v1643_v14, 0 }
 0x4ce   : > { %2514 = vmatmul.msk.bf16.vlgmr.msrb.gmra.mxu0 %vm329_vm1, %v1355_v3 }
 0x4cf   : > { %1594 = vmatpush.bf16.msra.mxu1 %v1585_v59  ;;  %v2716_v55 = vpop.eup %2715 }
 0x4d0   : > { %v1084_v4 = vmul.f32 %v2716_v55, %v3212_v57 }
 0x4d2   : > { %v1092_v9 = vpack.c.bf16 %v1084_v4, %v1084_v4 }
 0x4d4   : > { %2508 = vmatmul.msk.bf16.vlgmr.msrb.gmra.mxu2 %vm329_vm1, %v1092_v9  ;;  %v1134_v6 = vpop.f32.mrf.mxu1  ;;  %v1706_v24 = vpop.permute.xlu1 %1705 }
 0x4d5   : > { %1417 = vmatpush.bf16.xpose.msrb.mxu2 %v1408_v11  ;;  %v1559_v16 = vpop.permute.xlu2 %1558  ;;  %v1711_v30 = vsel %vm634_vm2, %v1706_v24, 0 }
 0x4d6   : > { %v1564_v17 = vsel %vm634_vm2, %v1559_v16, 0 }
 0x4d7   : > { %1573 = vmatpush.bf16.msra.mxu0 %v1564_v17 }
 0x4d9   : > { %2513 = vmatmul.msk.bf16.vlgmr.msra.gmra.mxu3 %vm329_vm1, %v1332_v43 }
 0x4db   : > { %1657 = vmatpush.bf16.msrb.mxu0 %v1648_v18  ;;  %v1401_v19 = vpop.permute.xlu0 %1400 }
 0x4dd   : > { %v1622_v20 = vpop.permute.xlu2 %1621 }
 0x4de   : > { %v1627_v57 = vsel %vm634_vm2, %v1622_v20, 0 }
 0x4df   : > { %1636 = vmatpush.bf16.msra.mxu3 %v1627_v57 }
 0x4e0   : > { %v3269_v15 = vpop.f32.mrf.mxu2 }
 0x4e3   : > { %v1378_v1 = vpop.permute.xlu0 %1377 }
 0x4e4   : > { %2512 = vmatmul.msk.bf16.vlgmr.msra.gmra.mxu2 %vm329_vm1, %v1309_v42  ;;  %2515 = vmatmul.msk.bf16.vlgmr.msrb.gmra.mxu1 %vm329_vm1, %v1378_v1 }
 0x4e5   : > { %v1664_v25 = vpop.permute.xlu2 %1663 }
 0x4e6   : > { %v1669_v29 = vsel %vm634_vm2, %v1664_v25, 0 }
 0x4e7   : > { %1678 = vmatpush.bf16.msrb.mxu1 %v1669_v29 }
 0x4e8   : > { %v1155_v27 = vpop.f32.mrf.mxu2 }
 0x4e9   : > { %2517 = vmatmul.msk.bf16.vlgmr.msrb.gmra.mxu3 %vm329_vm1, %v1424_v46 }
 0x4ea   : > { %1720 = vmatpush.bf16.msrb.mxu3 %v1711_v30 }
 0x4eb   : > { %v1601_v32 = vpop.permute.xlu0 %1600 }
 0x4ec   : > { %v1606_v36 = vsel %vm634_vm2, %v1601_v32, 0 }
 0x4ed   : > { %1615 = vmatpush.bf16.msra.mxu2 %v1606_v36 }
 0x4f3   : > { %v1685_v38 = vpop.permute.xlu0 %1684 }
 0x4f4   : > { %v1690_v39 = vsel %vm634_vm2, %v1685_v38, 0  ;;  %2516 = vmatmul.msk.bf16.vlgmr.msrb.gmra.mxu2 %vm329_vm1, %v1401_v19 }
 0x4f5   : > { %1699 = vmatpush.bf16.msrb.mxu2 %v1690_v39 }
 0x4fd   : > { %v3279_v40 = vpop.f32.mrf.mxu0 }
 0x4fe   : > { %v2592_v8 = vpack.i.bf16 %v3259_v62, %v3279_v40 }
 0x505   : > { %v1113_v31 = vpop.f32.mrf.mxu0 }
 0x50b   : > { %v3283_v41 = vpop.f32.mrf.mxu1 }
 0x50d   : > { %v3285_v42 = vpop.f32.mrf.mxu0 }
 0x50e   : > { %v2622_v43 = vpack.i.bf16 %v3283_v41, %v3285_v42 }
 0x513   : > { %v1218_v45 = vpop.f32.mrf.mxu1 }
 0x515   : > { %v1197_v44 = vpop.f32.mrf.mxu0 }
 0x51b   : > { %v3289_v48 = vpop.f32.mrf.mxu3 }
 0x51c   : > { %v2607_v49 = vpack.i.bf16 %v3289_v48, %v3269_v15 }
 0x51d   : > { %v1281_v46 = vpop.f32.mrf.mxu0 }
 0x51e   : > { %v1446_v50 = vmul.f32 0.17677669, %v1281_v46 }
 0x520   : > { %v1454_v51 = vadd.f32 %v1446_v50, %v2977_v12 }
 0x522   : > { %v1462_v52 = vsel %vm329_vm1, %v1454_v51, -inf }
 0x523   : > { %v1176_v53 = vpop.f32.mrf.mxu3  ;;  %1463 = vmax.xlane.f32.xlu1 %v1462_v52 }
 0x525   : > { %v1283_v47 = vpop.f32.mrf.mxu0 }
 0x52a   : > { %v1304_v54 = vpop.f32.mrf.mxu1 }
 0x52b   : > { %v1447_v56 = vmul.f32 0.17677669, %v1304_v54 }
 0x52d   : > { %v1455_v59 = vadd.f32 %v3298_v58, %v1447_v56 }
 0x52f   : > { %v1465_v61 = vsel %vm329_vm1, %v1455_v59, -inf }
 0x530   : > { %1466 = vmax.xlane.f32.xlu2 %v1465_v61 }
 0x532   : > { %v1306_v60 = vpop.f32.mrf.mxu1 }
 0x54b   : > { %v1373_v3 = vpop.f32.mrf.mxu0 }
 0x54c   : > { %v1450_v12 = vmul.f32 0.17677669, %v1373_v3  ;;  %v3302_v55 = vpop.f32.mrf.mxu3  ;;  %v3326_v3 = vpop.permute.xlu2 %1751 }
 0x54e   : > { %v1458_v4 = vadd.f32 %v3298_v58, %v1450_v12 }
 0x550   : > { %v1474_v9 = vsel %vm329_vm1, %v1458_v4, -inf }
 0x551   : > { %1475 = vmax.xlane.f32.xlu1 %v1474_v9 }
 0x553   : > { %v1375_v11 = vpop.f32.mrf.mxu0 }
 0x554   : > { %v1260_v14 = vpop.f32.mrf.mxu3 }
 0x557   : > { %v3306_v6 = vpop.f32.mrf.mxu2 }
 0x558   : > { %v2637_v16 = vpack.i.bf16 %v3302_v55, %v3306_v6 }
 0x55c   : > { %v1350_v17 = vpop.f32.mrf.mxu3 }
 0x55d   : > { %v1449_v18 = vmul.f32 0.17677669, %v1350_v17 }
 0x55f   : > { %v1239_v19 = vpop.f32.mrf.mxu2  ;;  %v1457_v20 = vadd.f32 %v3298_v58, %v1449_v18 }
 0x561   : > { %v1396_v57 = vpop.f32.mrf.mxu1  ;;  %v1471_v1 = vsel %vm329_vm1, %v1457_v20, -inf }
 0x562   : > { %1472 = vmax.xlane.f32.xlu2 %v1471_v1  ;;  %v1451_v32 = vmul.f32 0.17677669, %v1396_v57 }
 0x564   : > { %v1352_v25 = vpop.f32.mrf.mxu3  ;;  %v1459_v44 = vadd.f32 %v3298_v58, %v1451_v32 }
 0x566   : > { %v1477_v52 = vsel %vm329_vm1, %v1459_v44, -inf }
 0x567   : > { %v1327_v24 = vpop.f32.mrf.mxu2 }
 0x568   : > { %v1448_v29 = vmul.f32 0.17677669, %v1327_v24 }
 0x569   : > { %v1398_v27 = vpop.f32.mrf.mxu1 }
 0x56a   : > { %v1456_v30 = vadd.f32 %v3298_v58, %v1448_v29 }
 0x56c   : > { %v1442_v36 = vpop.f32.mrf.mxu3  ;;  %v1468_v38 = vsel %vm329_vm1, %v1456_v30, -inf }
 0x56d   : > { %v1453_v39 = vmul.f32 0.17677669, %v1442_v36  ;;  %1469 = vmax.xlane.f32.xlu0 %v1468_v38  ;;  %v1729_v36 = vpop.permute.xlu0 %1728 }
 0x56f   : > { %v1329_v31 = vpop.f32.mrf.mxu2  ;;  %v1461_v45 = vadd.f32 %v3298_v58, %v1453_v39 }
 0x571   : > { %v1483_v46 = vsel %vm329_vm1, %v1461_v45, -inf }
 0x572   : > { %1484 = vmax.xlane.f32.xlu1 %v1483_v46 }
 0x574   : > { %v1444_v50 = vpop.f32.mrf.mxu3 }
 0x575   : > { %1478 = vmax.xlane.f32.xlu0 %v1477_v52 }
 0x577   : > { %v1419_v53 = vpop.f32.mrf.mxu2 }
 0x578   : > { %v1452_v47 = vmul.f32 0.17677669, %v1419_v53 }
 0x57a   : > { %v1460_v54 = vadd.f32 %v3298_v58, %v1452_v47 }
 0x57c   : > { %v1480_v56 = vsel %vm329_vm1, %v1460_v54, -inf }
 0x57d   : > { %1481 = vmax.xlane.f32.xlu2 %v1480_v56 }
 0x57f   : > { %v1421_v61 = vpop.f32.mrf.mxu2 }
 0x589   : > { %1797 = vrot.lane.b32.xlu0 %v2878_v23, %s2798_s14 }
 0x58b   : > { %1774 = vrot.lane.b32.xlu1 %v2861_v10, %s2798_s14 }
 0x595   : > { %1726 = vrot.lane.b32.xlu2 %v2901_v35, %s2799_s17 }
 0x596   : > { %v1464_v60 = vpop.xlane.xlu1 %1463 }
 0x597   : > { %v1486_v12 = vsub.f32 %v1454_v51, %v1464_v60 }
 0x599   : > { %v1494_v9 = vmul.f32 1.442695, %v1486_v12 }
 0x59b   : > { %2717 = vpow2.f32 %v1494_v9 }
 0x5a1   : > { %v3328_v17 = vpop.eup %2717 }
 0x5a2   : > { %v1510_v19 = vsel %vm329_vm1, %v3328_v17, 0.0 }
 0x5a3   : > { %v1467_v11 = vpop.xlane.xlu2 %1466 }
 0x5a4   : > { %v1487_v14 = vsub.f32 %v1455_v59, %v1467_v11 }
 0x5a6   : > { %v1496_v18 = vmul.f32 1.442695, %v1487_v14 }
 0x5a8   : > { %2719 = vpow2.f32 %v1496_v18 }
 0x5ae   : > { %v3332_v57 = vpop.eup %2719 }
 0x5af   : > { %v1513_v1 = vsel %vm329_vm1, %v3332_v57, 0.0 }
 0x5b3   : > { %1511 = vadd.xlane.f32.xlu0 %v1510_v19 }
 0x5be   : > { %1514 = vadd.xlane.f32.xlu2 %v1513_v1 }
 0x5c4   : > { %v1476_v25 = vpop.xlane.xlu1 %1475 }
 0x5c5   : > { %v1490_v51 = vsub.f32 %v1458_v4, %v1476_v25 }
 0x5c7   : > { %v1502_v24 = vmul.f32 1.442695, %v1490_v51 }
 0x5c9   : > { %2721 = vpow2.f32 %v1502_v24 }
 0x5cf   : > { %v3336_v29 = vpop.eup %2721 }
 0x5d0   : > { %v1522_v59 = vsel %vm329_vm1, %v3336_v29, 0.0 }
 0x5d1   : > { %1523 = vadd.xlane.f32.xlu0 %v1522_v59 }
 0x5d5   : > { %v1473_v27 = vpop.xlane.xlu2 %1472 }
 0x5d6   : > { %v1489_v32 = vsub.f32 %v1457_v20, %v1473_v27 }
 0x5d8   : > { %v1500_v38 = vmul.f32 1.442695, %v1489_v32 }
 0x5da   : > { %2723 = vpow2.f32 %v1500_v38  ;;  %v1734_v38 = vsel %vm329_vm1, %v1729_v36, 0 }
 0x5e0   : > { %v3340_v39 = vpop.eup %2723  ;;  %v1470_v31 = vpop.xlane.xlu0 %1469 }
 0x5e1   : > { %v1488_v46 = vsub.f32 %v1456_v30, %v1470_v31  ;;  %v1519_v4 = vsel %vm329_vm1, %v3340_v39, 0.0 }
 0x5e2   : > { %1520 = vadd.xlane.f32.xlu0 %v1519_v4 }
 0x5e3   : > { %v1498_v50 = vmul.f32 1.442695, %v1488_v46 }
 0x5e5   : > { %2725 = vpow2.f32 %v1498_v50  ;;  %v1485_v52 = vpop.xlane.xlu1 %1484  ;;  %v1757_v50 = vsel %vm329_vm1, %v3326_v3, 0 }
 0x5e6   : > { %v1493_v53 = vsub.f32 %v1461_v45, %v1485_v52 }
 0x5e8   : > { %v1508_v47 = vmul.f32 1.442695, %v1493_v53  ;;  %v1479_v56 = vpop.xlane.xlu0 %1478 }
 0x5e9   : > { %v1491_v61 = vsub.f32 %v1459_v44, %v1479_v56 }
 0x5ea   : > { %2727 = vpow2.f32 %v1508_v47 }
 0x5eb   : > { %v3344_v20 = vpop.eup %2725  ;;  %v1504_v60 = vmul.f32 1.442695, %v1491_v61 }
 0x5ec   : > { %v1516_v12 = vsel %vm329_vm1, %v3344_v20, 0.0 }
 0x5ed   : > { %2729 = vpow2.f32 %v1504_v60  ;;  %1517 = vadd.xlane.f32.xlu1 %v1516_v12 }
 0x5f0   : > { %v3348_v30 = vpop.eup %2727  ;;  %v1482_v9 = vpop.xlane.xlu2 %1481 }
 0x5f1   : > { %v1492_v11 = vsub.f32 %v1460_v54, %v1482_v9  ;;  %v1531_v14 = vsel %vm329_vm1, %v3348_v30, 0.0 }
 0x5f2   : > { %1532 = vadd.xlane.f32.xlu0 %v1531_v14 }
 0x5f3   : > { %v3352_v45 = vpop.eup %2729  ;;  %v1506_v44 = vmul.f32 1.442695, %v1492_v11 }
 0x5f4   : > { %v1525_v18 = vsel %vm329_vm1, %v3352_v45, 0.0 }
 0x5f5   : > { %2731 = vpow2.f32 %v1506_v44  ;;  %1526 = vadd.xlane.f32.xlu1 %v1525_v18 }
 0x5f8   : > { %v1727_v51 = vpop.permute.xlu2 %1726 }
 0x5fb   : > { %v3356_v19 = vpop.eup %2731  ;;  %v1798_v54 = vpop.permute.xlu0 %1797 }
 0x5fc   : > { %v1528_v1 = vsel %vm329_vm1, %v3356_v19, 0.0  ;;  %v1803_v3 = vsel %vm329_vm1, %v1798_v54, 0 }
 0x5fd   : > { %1529 = vadd.xlane.f32.xlu2 %v1528_v1  ;;  %v1775_v56 = vpop.permute.xlu1 %1774 }
 0x606   : > { %1772 = vrot.lane.b32.xlu0 %v2861_v10, %s2799_s17 }
 0x60e   : > { %1749 = vrot.lane.b32.xlu1 %v2876_v22, %s2799_s17  ;;  %1843 = vrot.lane.b32.xlu0 %v2897_v33, %s2798_s14 }
 0x615   : > { %1795 = vrot.lane.b32.xlu2 %v2878_v23, %s2799_s17 }
 0x616   : > { %1820 = vrot.lane.b32.xlu1 %v2874_v21, %s2798_s14  ;;  %1818 = vrot.lane.b32.xlu0 %v2874_v21, %s2799_s17 }
 0x61d   : > { %1866 = vrot.lane.b32.xlu2 %v2910_v37, %s2798_s14 }
 0x61e   : > { %1889 = vrot.lane.b32.xlu1 %v2899_v34, %s2798_s14  ;;  %1887 = vrot.lane.b32.xlu0 %v2899_v34, %s2799_s17 }
 0x625   : > { %1841 = vrot.lane.b32.xlu2 %v2897_v33, %s2799_s17 }
 0x626   : > { %1864 = vrot.lane.b32.xlu1 %v2910_v37, %s2799_s17  ;;  %v1512_v25 = vpop.xlane.xlu0 %1511 }
 0x627   : > { %2733 = vrcp.f32 %v1512_v25 }
 0x62d   : > { %v2734_v24 = vpop.eup %2733 }
 0x62e   : > { %v1542_v59 = vmul.f32 %v2734_v24, %v3328_v17 }
 0x630   : > { %v1550_v27 = vpack.c.bf16 %v1542_v59, %v1542_v59 }
 0x631   : > { %v1515_v32 = vpop.xlane.xlu2 %1514 }
 0x632   : > { %2735 = vrcp.f32 %v1515_v32  ;;  %2518 = vmatmul.msk.bf16.vlgmr.msra.gmra.mxu0 %vm329_vm1, %v1550_v27 }
 0x633   : > { %1743 = vmatpush.bf16.xpose.msra.mxu0 %v1734_v38 }
 0x638   : > { %v2736_v31 = vpop.eup %2735 }
 0x639   : > { %v1543_v46 = vmul.f32 %v2736_v31, %v3332_v57 }
 0x63b   : > { %v1551_v4 = vpack.c.bf16 %v1543_v46, %v1543_v46 }
 0x63d   : > { %2519 = vmatmul.msk.bf16.vlgmr.msra.gmra.mxu1 %vm329_vm1, %v1551_v4 }
 0x63e   : > { %1766 = vmatpush.bf16.xpose.msra.mxu1 %v1757_v50 }
 0x644   : > { %v1524_v52 = vpop.xlane.xlu0 %1523 }
 0x645   : > { %2737 = vrcp.f32 %v1524_v52 }
 0x64b   : > { %v2738_v17 = vpop.eup %2737 }
 0x64c   : > { %v1546_v53 = vmul.f32 %v2738_v17, %v3336_v29 }
 0x64e   : > { %v1554_v36 = vpack.c.bf16 %v1546_v53, %v1546_v53 }
 0x650   : > { %2522 = vmatmul.msk.bf16.vlgmr.msrb.gmra.mxu0 %vm329_vm1, %v1554_v36 }
 0x655   : > { %v1521_v47 = vpop.xlane.xlu0 %1520 }
 0x656   : > { %2739 = vrcp.f32 %v1521_v47 }
 0x65c   : > { %v2740_v61 = vpop.eup %2739 }
 0x65d   : > { %v1545_v57 = vmul.f32 %v2740_v61, %v3340_v39  ;;  %v1780_v39 = vsel %vm329_vm1, %v1775_v56, 0 }
 0x65f   : > { %v1553_v60 = vpack.c.bf16 %v1545_v57, %v1545_v57 }
 0x660   : > { %v1518_v12 = vpop.xlane.xlu1 %1517  ;;  %2526 = vmatmul.msk.bf16.vlgmr.msra.gmra.mxu0 %vm329_vm1, %v1727_v51 }
 0x661   : > { %2741 = vrcp.f32 %v1518_v12  ;;  %2521 = vmatmul.msk.bf16.vlgmr.msra.gmra.mxu3 %vm329_vm1, %v1553_v60 }
 0x662   : > { %1812 = vmatpush.bf16.xpose.msra.mxu3 %v1803_v3 }
 0x665   : > { %v1533_v29 = vpop.xlane.xlu0 %1532 }
 0x666   : > { %2743 = vrcp.f32 %v1533_v29 }
 0x667   : > { %v2742_v9 = vpop.eup %2741 }
 0x668   : > { %v1544_v11 = vmul.f32 %v2742_v9, %v3344_v20  ;;  %v1527_v14 = vpop.xlane.xlu1 %1526 }
 0x669   : > { %2745 = vrcp.f32 %v1527_v14 }
 0x66a   : > { %v1552_v44 = vpack.c.bf16 %v1544_v11, %v1544_v11 }
 0x66c   : > { %v2744_v18 = vpop.eup %2743  ;;  %2520 = vmatmul.msk.bf16.vlgmr.msra.gmra.mxu2 %vm329_vm1, %v1552_v44 }
 0x66d   : > { %v1549_v1 = vmul.f32 %v2744_v18, %v3348_v30  ;;  %1789 = vmatpush.bf16.xpose.msra.mxu2 %v1780_v39 }
 0x66f   : > { %v2746_v54 = vpop.eup %2745  ;;  %v1557_v25 = vpack.c.bf16 %v1549_v1, %v1549_v1 }
 0x670   : > { %v1547_v51 = vmul.f32 %v2746_v54, %v3352_v45  ;;  %v1530_v24 = vpop.xlane.xlu2 %1529 }
 0x671   : > { %2747 = vrcp.f32 %v1530_v24  ;;  %2525 = vmatmul.msk.bf16.vlgmr.msrb.gmra.mxu3 %vm329_vm1, %v1557_v25 }
 0x672   : > { %v1555_v20 = vpack.c.bf16 %v1547_v51, %v1547_v51 }
 0x674   : > { %2523 = vmatmul.msk.bf16.vlgmr.msrb.gmra.mxu1 %vm329_vm1, %v1555_v20 }
 0x677   : > { %v2748_v59 = vpop.eup %2747 }
 0x678   : > { %v1548_v27 = vmul.f32 %v2748_v59, %v3356_v19  ;;  %v1796_v32 = vpop.permute.xlu2 %1795  ;;  %v1773_v38 = vpop.permute.xlu0 %1772 }
 0x67a   : > { %v1556_v31 = vpack.c.bf16 %v1548_v27, %v1548_v27 }
 0x67c   : > { %2524 = vmatmul.msk.bf16.vlgmr.msrb.gmra.mxu2 %vm329_vm1, %v1556_v31 }
 0x680   : > { %v1867_v30 = vpop.permute.xlu2 %1866  ;;  %v1750_v46 = vpop.permute.xlu1 %1749 }
 0x681   : > { %v1872_v4 = vsel %vm329_vm1, %v1867_v30, 0  ;;  %v1844_v45 = vpop.permute.xlu0 %1843  ;;  %2529 = vmatmul.msk.bf16.vlgmr.msra.gmra.mxu3 %vm329_vm1, %v1796_v32 }
 0x682   : > { %v1849_v50 = vsel %vm329_vm1, %v1844_v45, 0  ;;  %1881 = vmatpush.bf16.xpose.msrb.mxu2 %v1872_v4 }
 0x683   : > { %1858 = vmatpush.bf16.xpose.msrb.mxu1 %v1849_v50 }
 0x684   : > { %2527 = vmatmul.msk.bf16.vlgmr.msra.gmra.mxu1 %vm329_vm1, %v1750_v46 }
 0x688   : > { %v1821_v52 = vpop.permute.xlu1 %1820  ;;  %v1842_v47 = vpop.permute.xlu2 %1841 }
 0x689   : > { %v1826_v19 = vsel %vm329_vm1, %v1821_v52, 0  ;;  %v1819_v17 = vpop.permute.xlu0 %1818 }
 0x68a   : > { %1835 = vmatpush.bf16.xpose.msrb.mxu0 %v1826_v19 }
 0x68c   : > { %2528 = vmatmul.msk.bf16.vlgmr.msra.gmra.mxu2 %vm329_vm1, %v1773_v38 }
 0x690   : > { %v1890_v53 = vpop.permute.xlu1 %1889 }
 0x691   : > { %v1895_v36 = vsel %vm329_vm1, %v1890_v53, 0  ;;  %2530 = vmatmul.msk.bf16.vlgmr.msrb.gmra.mxu0 %vm329_vm1, %v1819_v17  ;;  %v1888_v56 = vpop.permute.xlu0 %1887 }
 0x692   : > { %1904 = vmatpush.bf16.xpose.msrb.mxu3 %v1895_v36 }
 0x694   : > { %2531 = vmatmul.msk.bf16.vlgmr.msrb.gmra.mxu1 %vm329_vm1, %v1842_v47 }
 0x698   : > { %v1865_v61 = vpop.permute.xlu1 %1864 }
 0x699   : > { %2533 = vmatmul.msk.bf16.vlgmr.msrb.gmra.mxu3 %vm329_vm1, %v1888_v56 }
 0x69c   : > { %2532 = vmatmul.msk.bf16.vlgmr.msrb.gmra.mxu2 %vm329_vm1, %v1865_v61 }
 0x6af   : > { %v3415_v57 = vpop.f32.mrf.mxu0 }
 0x6b7   : > { %v1577_v60 = vpop.f32.mrf.mxu0 }
 0x6ba   : > { %v3417_v12 = vpop.f32.mrf.mxu1 }
 0x6bb   : > { %v2597_v3 = vpack.i.bf16 %v3417_v12, %v3415_v57 }
 0x6c2   : > { %v1598_v29 = vpop.f32.mrf.mxu1 }
 0x6cd   : > { %v3421_v9 = vpop.f32.mrf.mxu0 }
 0x6d5   : > { %v1661_v11 = vpop.f32.mrf.mxu0 }
 0x6dd   : > { %v1745_v14 = vpop.f32.mrf.mxu0 }
 0x6de   : > { %v1910_v44 = vmul.f32 0.17677669, %v1745_v14 }
 0x6e0   : > { %v3424_v18 = vadd.f32 %v3298_v58, %v1910_v44 }
 0x6e2   : > { %v1926_v39 = vsel %vm329_vm1, %v3424_v18, -inf }
 0x6e3   : > { %1927 = vmax.xlane.f32.xlu2 %v1926_v39 }
 0x6e4   : > { %v3428_v1 = vpop.f32.mrf.mxu3 }
 0x6e5   : > { %v1747_v54 = vpop.f32.mrf.mxu0 }
 0x6ec   : > { %v1640_v25 = vpop.f32.mrf.mxu3 }
 0x6ef   : > { %v3430_v51 = vpop.f32.mrf.mxu2 }
 0x6f0   : > { %v2612_v24 = vpack.i.bf16 %v3428_v1, %v3430_v51 }
 0x6f1   : > { %v3434_v20 = vpop.f32.mrf.mxu1 }
 0x6f2   : > { %v2627_v59 = vpack.i.bf16 %v3434_v20, %v3421_v9 }
 0x6f4   : > { %v3438_v27 = vpop.f32.mrf.mxu3 }
 0x6f7   : > { %v1619_v32 = vpop.f32.mrf.mxu2 }
 0x6f9   : > { %v1682_v38 = vpop.f32.mrf.mxu1 }
 0x6fc   : > { %v1724_v31 = vpop.f32.mrf.mxu3 }
 0x6ff   : > { %v3440_v30 = vpop.f32.mrf.mxu2 }
 0x700   : > { %v2642_v46 = vpack.i.bf16 %v3438_v27, %v3440_v30 }
 0x701   : > { %v1768_v4 = vpop.f32.mrf.mxu1 }
 0x702   : > { %v1911_v45 = vmul.f32 0.17677669, %v1768_v4 }
 0x704   : > { %v1814_v50 = vpop.f32.mrf.mxu3  ;;  %v1919_v52 = vadd.f32 %v3298_v58, %v1911_v45 }
 0x705   : > { %v1913_v19 = vmul.f32 0.17677669, %v1814_v50 }
 0x706   : > { %v1929_v17 = vsel %vm329_vm1, %v1919_v52, -inf }
 0x707   : > { %v1703_v53 = vpop.f32.mrf.mxu2  ;;  %1930 = vmax.xlane.f32.xlu1 %v1929_v17  ;;  %v3447_v36 = vadd.f32 %v3298_v58, %v1913_v19 }
 0x709   : > { %v1770_v47 = vpop.f32.mrf.mxu1  ;;  %v1935_v56 = vsel %vm329_vm1, %v3447_v36, -inf }
 0x70a   : > { %1936 = vmax.xlane.f32.xlu2 %v1935_v56 }
 0x70c   : > { %v1816_v61 = vpop.f32.mrf.mxu3 }
 0x70e   : > { %v1837_v60 = vpop.f32.mrf.mxu0 }
 0x70f   : > { %v1914_v29 = vmul.f32 0.17677669, %v1837_v60  ;;  %v1791_v11 = vpop.f32.mrf.mxu2 }
 0x710   : > { %v1912_v32 = vmul.f32 0.17677669, %v1791_v11 }
 0x711   : > { %v1860_v14 = vpop.f32.mrf.mxu1  ;;  %v1922_v44 = vadd.f32 %v3298_v58, %v1914_v29 }
 0x712   : > { %v1915_v39 = vmul.f32 0.17677669, %v1860_v14  ;;  %v1920_v50 = vadd.f32 %v3298_v58, %v1912_v32 }
 0x713   : > { %v1938_v54 = vsel %vm329_vm1, %v1922_v44, -inf }
 0x714   : > { %1939 = vmax.xlane.f32.xlu1 %v1938_v54  ;;  %v1923_v25 = vadd.f32 %v3298_v58, %v1915_v39  ;;  %v1932_v53 = vsel %vm329_vm1, %v1920_v50, -inf }
 0x716   : > { %v1839_v38 = vpop.f32.mrf.mxu0  ;;  %v1941_v31 = vsel %vm329_vm1, %v1923_v25, -inf }
 0x717   : > { %v1793_v4 = vpop.f32.mrf.mxu2  ;;  %1942 = vmax.xlane.f32.xlu0 %v1941_v31 }
 0x719   : > { %v1862_v45 = vpop.f32.mrf.mxu1 }
 0x71c   : > { %v1906_v19 = vpop.f32.mrf.mxu3 }
 0x71d   : > { %v1917_v17 = vmul.f32 0.17677669, %v1906_v19 }
 0x71f   : > { %v1883_v47 = vpop.f32.mrf.mxu2  ;;  %1933 = vmax.xlane.f32.xlu0 %v1932_v53  ;;  %v1925_v56 = vadd.f32 %v3298_v58, %v1917_v17 }
 0x720   : > { %v1916_v61 = vmul.f32 0.17677669, %v1883_v47 }
 0x721   : > { %v1947_v60 = vsel %vm329_vm1, %v1925_v56, -inf }
 0x722   : > { %1948 = vmax.xlane.f32.xlu1 %v1947_v60  ;;  %v3460_v29 = vadd.f32 %v3298_v58, %v1916_v61 }
 0x724   : > { %v1908_v11 = vpop.f32.mrf.mxu3  ;;  %v1944_v14 = vsel %vm329_vm1, %v3460_v29, -inf }
 0x725   : > { %1945 = vmax.xlane.f32.xlu2 %v1944_v14 }
 0x727   : > { %v1885_v39 = vpop.f32.mrf.mxu2 }
 0x733   : > { %2043 = vrot.lane.b32.xlu0 %v2876_v22, %s2800_s19 }
 0x73b   : > { %2085 = vrot.lane.b32.xlu0 %v2878_v23, %s2800_s19  ;;  %2022 = vrot.lane.b32.xlu1 %v2901_v35, %s2800_s19 }
 0x73d   : > { %2064 = vrot.lane.b32.xlu2 %v2861_v10, %s2800_s19 }
 0x745   : > { %2106 = vrot.lane.b32.xlu2 %v2874_v21, %s2800_s19 }
 0x756   : > { %v1928_v58 = vpop.xlane.xlu2 %1927 }
 0x757   : > { %v1950_v54 = vsub.f32 %v3424_v18, %v1928_v58 }
 0x759   : > { %v1958_v32 = vmul.f32 1.442695, %v1950_v54 }
 0x75b   : > { %2749 = vpow2.f32 %v1958_v32 }
 0x761   : > { %v3475_v38 = vpop.eup %2749 }
 0x762   : > { %v1974_v22 = vsel %vm329_vm1, %v3475_v38, 0.0 }
 0x765   : > { %1975 = vadd.xlane.f32.xlu0 %v1974_v22 }
 0x77a   : > { %v1931_v23 = vpop.xlane.xlu1 %1930 }
 0x77b   : > { %v1951_v31 = vsub.f32 %v1919_v52, %v1931_v23 }
 0x77d   : > { %v1960_v35 = vmul.f32 1.442695, %v1951_v31  ;;  %v1937_v47 = vpop.xlane.xlu2 %1936 }
 0x77e   : > { %v1953_v39 = vsub.f32 %v3447_v36, %v1937_v47 }
 0x77f   : > { %2751 = vpow2.f32 %v1960_v35 }
 0x780   : > { %v1964_v23 = vmul.f32 1.442695, %v1953_v39 }
 0x785   : > { %v3479_v4 = vpop.eup %2751 }
 0x786   : > { %v1977_v10 = vsel %vm329_vm1, %v3479_v4, 0.0 }
 0x787   : > { %1978 = vadd.xlane.f32.xlu2 %v1977_v10  ;;  %v1940_v21 = vpop.xlane.xlu1 %1939 }
 0x788   : > { %v1954_v18 = vsub.f32 %v1922_v44, %v1940_v21 }
 0x78a   : > { %v1966_v45 = vmul.f32 1.442695, %v1954_v18  ;;  %v1943_v19 = vpop.xlane.xlu0 %1942 }
 0x78b   : > { %v1955_v17 = vsub.f32 %v1923_v25, %v1943_v19 }
 0x78c   : > { %2753 = vpow2.f32 %v1966_v45 }
 0x78d   : > { %v1968_v53 = vmul.f32 1.442695, %v1955_v17 }
 0x78f   : > { %2755 = vpow2.f32 %v1968_v53 }
 0x792   : > { %v3483_v61 = vpop.eup %2753  ;;  %v1934_v52 = vpop.xlane.xlu0 %1933 }
 0x793   : > { %v1952_v60 = vsub.f32 %v1920_v50, %v1934_v52  ;;  %v1986_v11 = vsel %vm329_vm1, %v3483_v61, 0.0 }
 0x794   : > { %1987 = vadd.xlane.f32.xlu1 %v1986_v11 }
 0x795   : > { %v3487_v14 = vpop.eup %2755  ;;  %v1962_v44 = vmul.f32 1.442695, %v1952_v60  ;;  %v1949_v58 = vpop.xlane.xlu1 %1948 }
 0x796   : > { %v1957_v54 = vsub.f32 %v1925_v56, %v1949_v58  ;;  %v1989_v25 = vsel %vm329_vm1, %v3487_v14, 0.0 }
 0x797   : > { %2757 = vpow2.f32 %v1962_v44  ;;  %1990 = vadd.xlane.f32.xlu0 %v1989_v25 }
 0x798   : > { %v1972_v32 = vmul.f32 1.442695, %v1957_v54  ;;  %v1946_v22 = vpop.xlane.xlu2 %1945 }
 0x79a   : > { %2759 = vpow2.f32 %v1972_v32 }
 0x79b   : > { %2761 = vpow2.f32 %v1964_v23 }
 0x79d   : > { %v3492_v50 = vpop.eup %2757 }
 0x79e   : > { %v1980_v31 = vsel %vm329_vm1, %v3492_v50, 0.0 }
 0x79f   : > { %1981 = vadd.xlane.f32.xlu2 %v1980_v31 }
 0x7a0   : > { %v3496_v36 = vpop.eup %2759  ;;  %v2065_v35 = vpop.permute.xlu2 %2064 }
 0x7a1   : > { %v2070_v56 = vsel %vm634_vm2, %v2065_v35, 0  ;;  %v1995_v10 = vsel %vm329_vm1, %v3496_v36, 0.0  ;;  %v3501_v21 = vpop.eup %2761 }
 0x7a2   : > { %2079 = vmatpush.bf16.msra.mxu2 %v2070_v56  ;;  %1996 = vadd.xlane.f32.xlu1 %v1995_v10  ;;  %v1983_v19 = vsel %vm329_vm1, %v3501_v21, 0.0 }
 0x7a5   : > { %v2044_v18 = vpop.permute.xlu0 %2043 }
 0x7a6   : > { %v2049_v45 = vsel %vm634_vm2, %v2044_v18, 0 }
 0x7a7   : > { %1984 = vadd.xlane.f32.xlu2 %v1983_v19  ;;  %2058 = vmatpush.bf16.msra.mxu1 %v2049_v45 }
 0x7a8   : > { %v2107_v17 = vpop.permute.xlu2 %2106 }
 0x7a9   : > { %v2112_v11 = vsel %vm634_vm2, %v2107_v17, 0 }
 0x7ab   : > { %2148 = vrot.lane.b32.xlu0 %v2910_v37, %s2800_s19 }
 0x7ad   : > { %v2023_v53 = vpop.permute.xlu1 %2022  ;;  %v2086_v47 = vpop.permute.xlu0 %2085 }
 0x7ae   : > { %v2028_v52 = vsel %vm634_vm2, %v2023_v53, 0  ;;  %v2091_v60 = vsel %vm634_vm2, %v2086_v47, 0 }
 0x7af   : > { %2037 = vmatpush.bf16.msra.mxu0 %v2028_v52  ;;  %2100 = vmatpush.bf16.msra.mxu3 %v2091_v60 }
 0x7b3   : > { %2121 = vmatpush.bf16.msrb.mxu0 %v2112_v11  ;;  %2593 = vrot.lane.b32.xlu0 %v2592_v8, %s2801_s20 }
 0x7bb   : > { %2169 = vrot.lane.b32.xlu1 %v2899_v34, %s2800_s19  ;;  %2598 = vrot.lane.b32.xlu0 %v2597_v3, %s2802_s21  ;;  %v1956_v34 = vsub.f32 %v3460_v29, %v1946_v22 }
 0x7bd   : > { %v1970_v62 = vmul.f32 1.442695, %v1956_v34 }
 0x7bf   : > { %2127 = vrot.lane.b32.xlu2 %v2897_v33, %s2800_s19 }
 0x7c3   : > { %2613 = vrot.lane.b32.xlu0 %v2612_v24, %s2802_s21 }
 0x7cb   : > { %2623 = vrot.lane.b32.xlu0 %v2622_v43, %s2801_s20 }
 0x7d8   : > { %v1976_v37 = vpop.xlane.xlu0 %1975 }
 0x7d9   : > { %2763 = vrcp.f32 %v1976_v37 }
 0x7da   : > { %2765 = vpow2.f32 %v1970_v62 }
 0x7df   : > { %v2764_v40 = vpop.eup %2763 }
 0x7e0   : > { %v2006_v8 = vmul.f32 %v2764_v40, %v3475_v38  ;;  %v2766_v57 = vpop.eup %2765 }
 0x7e1   : > { %v1992_v12 = vsel %vm329_vm1, %v2766_v57, 0.0 }
 0x7e2   : > { %v2014_v33 = vpack.c.bf16 %v2006_v8, %v2006_v8 }
 0x7e4   : > { %2534 = vmatmul.msk.bf16.vlgmr.msra.gmra.mxu0 %vm329_vm1, %v2014_v33 }
 0x7e8   : > { %1993 = vadd.xlane.f32.xlu2 %v1992_v12 }
 0x7fa   : > { %v1979_v3 = vpop.xlane.xlu2 %1978 }
 0x7fb   : > { %2767 = vrcp.f32 %v1979_v3 }
 0x800   : > { %2608 = vrot.lane.b32.xlu2 %v2607_v49, %s2801_s20 }
 0x801   : > { %v2768_v41 = vpop.eup %2767 }
 0x802   : > { %v2007_v42 = vmul.f32 %v2768_v41, %v3479_v4  ;;  %v2563_v41 = vld [vmem:[%s3629_s2 + $0x8] sm:$0xff] }
 0x803   : > { %2354 = vmatpush.bf16.msra.mxu0 %v2563_v41 }
 0x804   : > { %v2015_v43 = vpack.c.bf16 %v2007_v42, %v2007_v42  ;;  %v2562_v42 = vld [vmem:[%s3629_s2] sm:$0xff] }
 0x806   : > { %2535 = vmatmul.msk.bf16.vlgmr.msra.gmra.mxu1 %vm329_vm1, %v2015_v43 }
 0x807   : > { %v1988_v1 = vpop.xlane.xlu1 %1987  ;;  %2355 = vmatpush.bf16.msra.mxu0 %v2562_v42 }
 0x808   : > { %2769 = vrcp.f32 %v1988_v1  ;;  %2643 = vrot.lane.b32.xlu2 %v2642_v46, %s2802_s21 }
 0x80a   : > { %v1991_v15 = vpop.xlane.xlu0 %1990 }
 0x80e   : > { %v2770_v51 = vpop.eup %2769 }
 0x80f   : > { %v2010_v24 = vmul.f32 %v2770_v51, %v3483_v61 }
 0x811   : > { %v2018_v29 = vpack.c.bf16 %v2010_v24, %v2010_v24 }
 0x812   : > { %v1982_v38 = vpop.xlane.xlu2 %1981 }
 0x813   : > { %2771 = vrcp.f32 %v1982_v38  ;;  %2538 = vmatmul.msk.bf16.vlgmr.msrb.gmra.mxu0 %vm329_vm1, %v2018_v29 }
 0x814   : > { %2773 = vrcp.f32 %v1991_v15 }
 0x815   : > { %v1997_v32 = vpop.xlane.xlu1 %1996 }
 0x819   : > { %v2772_v48 = vpop.eup %2771 }
 0x81a   : > { %v2008_v49 = vmul.f32 %v2772_v48, %v3492_v50  ;;  %v1985_v4 = vpop.xlane.xlu2 %1984  ;;  %v2774_v58 = vpop.eup %2773 }
 0x81b   : > { %2775 = vrcp.f32 %v1985_v4  ;;  %v2011_v46 = vmul.f32 %v2774_v58, %v3487_v14 }
 0x81c   : > { %v2016_v39 = vpack.c.bf16 %v2008_v49, %v2008_v49  ;;  %2777 = vrcp.f32 %v1997_v32 }
 0x81d   : > { %v2149_v44 = vpop.permute.xlu0 %2148  ;;  %v2019_v23 = vpack.c.bf16 %v2011_v46, %v2011_v46 }
 0x81e   : > { %v2154_v27 = vsel %vm634_vm2, %v2149_v44, 0  ;;  %2536 = vmatmul.msk.bf16.vlgmr.msra.gmra.mxu2 %vm329_vm1, %v2016_v39 }
 0x81f   : > { %2163 = vmatpush.bf16.msrb.mxu2 %v2154_v27 }
 0x821   : > { %v2776_v30 = vpop.eup %2775 }
 0x822   : > { %v2009_v61 = vmul.f32 %v2776_v30, %v3501_v21  ;;  %v2128_v54 = vpop.permute.xlu2 %2127  ;;  %v2778_v50 = vpop.eup %2777 }
 0x823   : > { %v2133_v25 = vsel %vm634_vm2, %v2128_v54, 0  ;;  %v2013_v14 = vmul.f32 %v2778_v50, %v3496_v36 }
 0x824   : > { %v2017_v22 = vpack.c.bf16 %v2009_v61, %v2009_v61  ;;  %2142 = vmatpush.bf16.msrb.mxu1 %v2133_v25 }
 0x825   : > { %v2021_v56 = vpack.c.bf16 %v2013_v14, %v2013_v14  ;;  %v2594_v43 = vpop.permute.xlu0 %2593 }
 0x826   : > { %2537 = vmatmul.msk.bf16.vlgmr.msra.gmra.mxu3 %vm329_vm1, %v2017_v22  ;;  %v2596_v51 = vunpack.i.h.bf16 %v2594_v43  ;;  %v2595_v55 = vunpack.i.l.bf16 %v2594_v43 }
 0x827   : > { %2539 = vmatmul.msk.bf16.vlgmr.msrb.gmra.mxu1 %vm329_vm1, %v2019_v23 }
 0x828   : > { %v2287_v29 = vsel %vm329_vm1, %v3125_v2, %v2596_v51  ;;  %v2286_v38 = vsel %vm329_vm1, %v3123_v63, %v2595_v55 }
 0x82d   : > { %v2170_v31 = vpop.permute.xlu1 %2169  ;;  %v2599_v1 = vpop.permute.xlu0 %2598 }
 0x82e   : > { %v2175_v35 = vsel %vm634_vm2, %v2170_v31, 0  ;;  %v2601_v6 = vunpack.i.h.bf16 %v2599_v1 }
 0x82f   : > { %2184 = vmatpush.bf16.msrb.mxu3 %v2175_v35 }
 0x830   : > { %v2296_v4 = vsel %vm2294_vm3, %v2287_v29, %v2601_v6 }
 0x835   : > { %v2614_v30 = vpop.permute.xlu0 %2613 }
 0x836   : > { %2541 = vmatmul.msk.bf16.vlgmr.msrb.gmra.mxu3 %vm329_vm1, %v2021_v56  ;;  %v2616_v54 = vunpack.i.h.bf16 %v2614_v30  ;;  %v2615_v25 = vunpack.i.l.bf16 %v2614_v30 }
 0x83d   : > { %v2624_v56 = vpop.permute.xlu0 %2623 }
 0x85b   : > { %v1994_v10 = vpop.xlane.xlu2 %1993 }
 0x85c   : > { %2779 = vrcp.f32 %v1994_v10 }
 0x861   : > { %v2039_v21 = vpop.f32.mrf.mxu0 }
 0x862   : > { %v2780_v18 = vpop.eup %2779 }
 0x863   : > { %v2012_v45 = vmul.f32 %v2780_v18, %v2766_v57  ;;  %v2609_v27 = vpop.permute.xlu2 %2608 }
 0x864   : > { %v2611_v46 = vunpack.i.h.bf16 %v2609_v27  ;;  %v2610_v2 = vunpack.i.l.bf16 %v2609_v27 }
 0x865   : > { %v2020_v19 = vpack.c.bf16 %v2012_v45, %v2012_v45 }
 0x866   : > { %v2289_v63 = vsel %vm329_vm1, %v3127_v5, %v2611_v46  ;;  %v2288_v61 = vsel %vm329_vm1, %v3121_v0, %v2610_v2  ;;  %v2625_v0 = vunpack.i.l.bf16 %v2624_v56 }
 0x867   : > { %2540 = vmatmul.msk.bf16.vlgmr.msrb.gmra.mxu2 %vm329_vm1, %v2020_v19  ;;  %v2297_v50 = vsel %vm2294_vm3, %v2288_v61, %v2615_v25  ;;  %v2298_v31 = vsel %vm2294_vm3, %v2289_v63, %v2616_v54 }
 0x869   : > { %v2041_v17 = vpop.f32.mrf.mxu0 }
 0x883   : > { %v2060_v53 = vpop.f32.mrf.mxu1 }
 0x884   : > { %v2602_v47 = vpack.i.bf16 %v2060_v53, %v2039_v21  ;;  %v2626_v21 = vunpack.i.h.bf16 %v2624_v56  ;;  %v2290_v53 = vsel %vm329_vm1, %v3137_v26, %v2625_v0 }
 0x886   : > { %2603 = vrot.lane.b32.xlu1 %v2602_v47, %s2803_s23  ;;  %v2291_v17 = vsel %vm329_vm1, %v3129_v7, %v2626_v21 }
 0x88b   : > { %v2062_v52 = vpop.f32.mrf.mxu1 }
 0x890   : > { %v2123_v60 = vpop.f32.mrf.mxu0 }
 0x898   : > { %v2125_v11 = vpop.f32.mrf.mxu0 }
 0x8a1   : > { %v2081_v36 = vpop.f32.mrf.mxu2 }
 0x8a4   : > { %v2144_v34 = vpop.f32.mrf.mxu1 }
 0x8a5   : > { %v2632_v37 = vpack.i.bf16 %v2144_v34, %v2123_v60 }
 0x8a7   : > { %2633 = vrot.lane.b32.xlu0 %v2632_v37, %s2803_s23 }
 0x8a9   : > { %v2083_v62 = vpop.f32.mrf.mxu2  ;;  %v2102_v40 = vpop.f32.mrf.mxu3 }
 0x8aa   : > { %v2617_v8 = vpack.i.bf16 %v2102_v40, %v2081_v36 }
 0x8ac   : > { %2618 = vrot.lane.b32.xlu1 %v2617_v8, %s2803_s23  ;;  %v2146_v33 = vpop.f32.mrf.mxu1  ;;  %v2644_v8 = vpop.permute.xlu2 %2643 }
 0x8b1   : > { %v2104_v57 = vpop.f32.mrf.mxu3 }
 0x8b2   : > { %v2646_v57 = vunpack.i.h.bf16 %v2644_v8 }
 0x8b4   : > { %2628 = vrot.lane.b32.xlu1 %v2627_v59, %s2802_s21 }
 0x8b9   : > { %v2186_v12 = vpop.f32.mrf.mxu3 }
 0x8bc   : > { %2638 = vrot.lane.b32.xlu1 %v2637_v16, %s2801_s20  ;;  %v2600_v16 = vunpack.i.l.bf16 %v2599_v1 }
 0x8be   : > { %v2295_v49 = vsel %vm2294_vm3, %v2286_v38, %v2600_v16 }
 0x8c1   : > { %v2188_v3 = vpop.f32.mrf.mxu3 }
 0x8ea   : > { %v2165_v9 = vpop.f32.mrf.mxu2 }
 0x8eb   : > { %v2647_v20 = vpack.i.bf16 %v2186_v12, %v2165_v9  ;;  %v2645_v12 = vunpack.i.l.bf16 %v2644_v8 }
 0x8ed   : > { %2648 = vrot.lane.b32.xlu0 %v2647_v20, %s2803_s23 }
 0x8f2   : > { %v2167_v59 = vpop.f32.mrf.mxu2 }
 0x8f8   : > { %v2604_v24 = vpop.permute.xlu1 %2603 }
 0x8f9   : > { %v2606_v15 = vunpack.i.h.bf16 %v2604_v24  ;;  %v2605_v48 = vunpack.i.l.bf16 %v2604_v24 }
 0x8fb   : > { %v2304_v39 = vsel %vm2303_vm4, %v2295_v49, %v2605_v48  ;;  %v2305_v44 = vsel %vm2303_vm4, %v2296_v4, %v2606_v15 }
 0x8fc   : > { %v2312_v58 = vpack.c.bf16 %v2305_v44, %v2304_v39 }
 0x8fe   : > { %2550 = vmatmul.msk.bf16.vlgmr.msra.gmra.mxu0 %vm273_vm0, %v2312_v58 }
 0x919   : > { %v2634_v19 = vpop.permute.xlu0 %2633 }
 0x91a   : > { %v2636_v60 = vunpack.i.h.bf16 %v2634_v19  ;;  %v2635_v11 = vunpack.i.l.bf16 %v2634_v19 }
 0x91e   : > { %v2619_v32 = vpop.permute.xlu1 %2618 }
 0x91f   : > { %v2621_v22 = vunpack.i.h.bf16 %v2619_v32  ;;  %v2620_v23 = vunpack.i.l.bf16 %v2619_v32 }
 0x921   : > { %v2306_v35 = vsel %vm2303_vm4, %v2297_v50, %v2620_v23  ;;  %v2307_v14 = vsel %vm2303_vm4, %v2298_v31, %v2621_v22 }
 0x922   : > { %v2313_v10 = vpack.c.bf16 %v2307_v14, %v2306_v35 }
 0x924   : > { %2551 = vmatmul.msk.bf16.gmra.mxu0 %vm273_vm0, %v2313_v10 }
 0x926   : > { %v2629_v5 = vpop.permute.xlu1 %2628 }
 0x927   : > { %v2631_v18 = vunpack.i.h.bf16 %v2629_v5  ;;  %v2630_v45 = vunpack.i.l.bf16 %v2629_v5 }
 0x929   : > { %v2299_v47 = vsel %vm2294_vm3, %v2290_v53, %v2630_v45  ;;  %v2300_v52 = vsel %vm2294_vm3, %v2291_v17, %v2631_v18 }
 0x92a   : > { %v2308_v36 = vsel %vm2303_vm4, %v2299_v47, %v2635_v11  ;;  %v2309_v34 = vsel %vm2303_vm4, %v2300_v52, %v2636_v60 }
 0x92b   : > { %v2314_v37 = vpack.c.bf16 %v2309_v34, %v2308_v36 }
 0x92e   : > { %v2639_v62 = vpop.permute.xlu1 %2638 }
 0x92f   : > { %v2641_v40 = vunpack.i.h.bf16 %v2639_v62  ;;  %v2640_v7 = vunpack.i.l.bf16 %v2639_v62 }
 0x931   : > { %v2293_v26 = vsel %vm329_vm1, %v3139_v28, %v2641_v40  ;;  %v2292_v33 = vsel %vm329_vm1, %v3131_v13, %v2640_v7  ;;  %v2652_v13 = vld [vmem:[%s3630_s3] ss:$0 sm:$0xff] }
 0x932   : > { %v2301_v43 = vsel %vm2294_vm3, %v2292_v33, %v2645_v12  ;;  %v2302_v9 = vsel %vm2294_vm3, %v2293_v26, %v2646_v57 }
 0x934   : > { %2552 = vmatmul.msk.bf16.gmra.mxu0 %vm273_vm0, %v2314_v37 }
 0x95f   : > { %v2649_v3 = vpop.permute.xlu0 %2648 }
 0x960   : > { %v2651_v41 = vunpack.i.h.bf16 %v2649_v3  ;;  %v2650_v42 = vunpack.i.l.bf16 %v2649_v3 }
 0x962   : > { %v2311_v20 = vsel %vm2303_vm4, %v2302_v9, %v2651_v41  ;;  %v2310_v59 = vsel %vm2303_vm4, %v2301_v43, %v2650_v42 }
 0x963   : > { %v2315_v1 = vpack.c.bf16 %v2311_v20, %v2310_v59 }
 0x965   : > { %2553 = vmatmul.msk.bf16.gmra.mxu0 %vm273_vm0, %v2315_v1 }
 0x97b   : > { %v2357_v28 = vpop.f32.mrf.mxu0 }
 0x97c   : > { %v2358_v51 = vadd.f32 %v2652_v13, %v2357_v28 }
 0x97e   : > { %2377 = vst.msk [vmem:[%s226_s8] sm:$0xff] %vm273_vm0, %v2358_v51 }
 0x983   : > { %v2359_v55 = vpop.f32.mrf.mxu0 }
 0x984   : > { %v2360_v6 = vadd.f32 %v2652_v13, %v2359_v55 }
 0x986   : > { %2378 = vst.msk [vmem:[%s226_s8 + $0x8] sm:$0xff] %vm273_vm0, %v2360_v6 }
 0x9a1   : > { %v2362_v16 = vpop.f32.mrf.mxu0 }
 0x9a2   : > { %v2363_v24 = vadd.f32 %v2652_v13, %v2362_v16 }
 0x9a4   : > { %2379 = vst.msk [vmem:[%s226_s8 + $0x10] sm:$0xff] %vm273_vm0, %v2363_v24 }
 0x9a9   : > { %v2364_v29 = vpop.f32.mrf.mxu0 }
 0x9aa   : > { %v2365_v38 = vadd.f32 %v2652_v13, %v2364_v29 }
 0x9ac   : > { %2380 = vst.msk [vmem:[%s226_s8 + $0x18] sm:$0xff] %vm273_vm0, %v2365_v38 }
 0x9b1   : > { %v2367_v15 = vpop.f32.mrf.mxu0 }
 0x9b2   : > { %v2368_v48 = vadd.f32 %v2652_v13, %v2367_v15 }
 0x9b4   : > { %2381 = vst.msk [vmem:[%s226_s8 + $0x20] sm:$0xff] %vm273_vm0, %v2368_v48 }
 0x9b9   : > { %v2369_v49 = vpop.f32.mrf.mxu0 }
 0x9ba   : > { %v2370_v4 = vadd.f32 %v2652_v13, %v2369_v49 }
 0x9bc   : > { %2382 = vst.msk [vmem:[%s226_s8 + $0x28] sm:$0xff] %vm273_vm0, %v2370_v4 }
 0x9e2   : > { %v2372_v39 = vpop.f32.mrf.mxu0 }
 0x9e3   : > { %v2373_v44 = vadd.f32 %v2652_v13, %v2372_v39 }
 0x9e5   : > { %2383 = vst.msk [vmem:[%s226_s8 + $0x30] sm:$0xff] %vm273_vm0, %v2373_v44 }
 0x9ea   : > { %v2374_v58 = vpop.f32.mrf.mxu0 }
 0x9eb   : > { %v2375_v27 = vadd.f32 %v2652_v13, %v2374_v58 }
 0x9ed   : > { %2384 = vst.msk [vmem:[%s226_s8 + $0x38] sm:$0xff] %vm273_vm0, %v2375_v27 }
 0x9ee PF: > { %s15_s18 = sadd.s32 1, %s2788_s18  }
 0x9ef   : > { %p12_p4 = scmp.ge.s32.totalorder %s15_s18, 4  }
 0x9f1   :  { %14 = sbr.rel (!%p12_p4) target bundleno = 1 (0x1), region = 70 }

</bundles_post_ra>
